<compile_context>
chip_gen: v5e
topology: v5e:2x2
jax: 0.10.0
libtpu: 0.0.40
codegen_flags: <defaults>
</compile_context>

<pallas_src>
import functools

import jax
import jax.numpy as jnp
from jax.experimental import pallas as pl
from jax.experimental.pallas import tpu as pltpu

LOG_SIG_MAX = 2.0
LOG_SIG_MIN = -20.0

IN_DIM = 39            # true input feature dim
HID = 512              # hidden width
OUT_DIM = 2            # true output dim of each head
PAD_IN = 128           # lane-padded input dim
PAD_HEAD = 128         # lane-padded fused-head output dim (mean cols 0:2, log_std cols 2:4)
BIAS_ROWS = 8          # sublane-aligned bias slab rows


def _round_up(x, m):
    return (x + m - 1) // m * m


def _cdiv(a, b):
    return -(-a // b)


def _detect_num_tensorcores():
    """2 for chips with two TensorCores per device (v7x / megacore), else 1."""
    try:
        kind = jax.devices()[0].device_kind.lower()
    except Exception:
        return 1
    for tag in ("v7", "v4", "v5p"):
        if tag in kind:
            return 2
    return 1


_NUM_TENSORCORES = _detect_num_tensorcores()


# ----------------------------------------------------------------------------
# Kernel: whole MLP forward for one batch tile; all weights VMEM-resident.
# ----------------------------------------------------------------------------
def actor_kernel(x_ref, w1_ref, w2_ref, w3_ref, wh_ref, b_ref, out_ref):
    x = x_ref[...]                                                       # (TB, 128) bf16

    h = jnp.dot(x, w1_ref[...], preferred_element_type=jnp.float32) + b_ref[0:1, :]
    h = jnp.maximum(h, 0.0).astype(jnp.bfloat16)                         # ReLU fc1

    h = jnp.dot(h, w2_ref[...], preferred_element_type=jnp.float32) + b_ref[1:2, :]
    h = jnp.maximum(h, 0.0).astype(jnp.bfloat16)                         # ReLU fc2

    h = jnp.dot(h, w3_ref[...], preferred_element_type=jnp.float32) + b_ref[2:3, :]
    h = jnp.maximum(h, 0.0).astype(jnp.bfloat16)                         # ReLU fc3

    # fused heads: cols 0:2 = mean (unclamped), cols 2:4 = log_std (clamped here)
    out = jnp.dot(h, wh_ref[...], preferred_element_type=jnp.float32) + b_ref[3:4, :PAD_HEAD]
    col = jax.lax.broadcasted_iota(jnp.int32, out.shape, 1)
    is_log_std = (col >= OUT_DIM) & (col < 2 * OUT_DIM)
    out_ref[...] = jnp.where(is_log_std,
                             jnp.clip(out, LOG_SIG_MIN, LOG_SIG_MAX),
                             out)


# ----------------------------------------------------------------------------
# One-time parameter preparation (hoisted out of the per-call path).
# ----------------------------------------------------------------------------
def prepare_params(params):
    """Pad w1 to 128 rows, fuse+pad the two heads, pack biases, cast to bf16.

    Call ONCE; the returned dict is what `actor_forward` consumes.
    """
    w1p = jnp.zeros((PAD_IN, HID), jnp.bfloat16)
    w1p = w1p.at[:IN_DIM, :].set(params["w1"].astype(jnp.bfloat16))

    wh = jnp.zeros((HID, PAD_HEAD), jnp.bfloat16)
    wh = wh.at[:, :OUT_DIM].set(params["wm"].astype(jnp.bfloat16))
    wh = wh.at[:, OUT_DIM:2 * OUT_DIM].set(params["ws"].astype(jnp.bfloat16))

    # Consolidated bias slab: rows 0..2 = b1..b3, row 3[:PAD_HEAD] = fused head bias.
    biases = jnp.zeros((BIAS_ROWS, HID), jnp.float32)
    biases = biases.at[0, :].set(params["b1"].astype(jnp.float32))
    biases = biases.at[1, :].set(params["b2"].astype(jnp.float32))
    biases = biases.at[2, :].set(params["b3"].astype(jnp.float32))
    biases = biases.at[3, :OUT_DIM].set(params["bm"].astype(jnp.float32))
    biases = biases.at[3, OUT_DIM:2 * OUT_DIM].set(params["bs"].astype(jnp.float32))

    return dict(
        w1=w1p,
        w2=params["w2"].astype(jnp.bfloat16),
        w3=params["w3"].astype(jnp.bfloat16),
        wh=wh,
        biases=biases,
    )


# ----------------------------------------------------------------------------
# Batch-tile selection (static, per review):
#   * minimize padding (<= 7 rows per tile, never ~2x),
#   * single-TC chips: one big tile (amortize ~0.35 us/step grid overhead),
#   * 2-TC chips (v7x): force n_tiles to a multiple of num_cores once each
#     tile can still hold >= 256 rows, so megacore batch-split kicks in.
# ----------------------------------------------------------------------------
def _select_batch_tiling(B, tile_b, num_cores):
    n_tiles = max(1, _cdiv(B, tile_b))
    if num_cores > 1 and B >= 256 * num_cores:
        n_tiles = _round_up(n_tiles, num_cores)
    tb = _round_up(_cdiv(B, n_tiles), 8)       # sublane-aligned tile
    b_pad = tb * n_tiles
    return tb, n_tiles, b_pad


@functools.partial(jax.jit, static_argnames=("tb", "n_tiles", "b_pad"))
def _actor_forward_impl(state, prepared, *, tb, n_tiles, b_pad):
    B = state.shape[0]

    # Only per-call glue: lane-align the 39-dim input. Built in bf16 so the
    # pad slab costs half the HBM write+read of the previous f32 version.
    x_pad = jnp.zeros((b_pad, PAD_IN), jnp.bfloat16)
    x_pad = x_pad.at[:B, :IN_DIM].set(state.astype(jnp.bfloat16))

    const = lambda i: (0, 0)                   # weights/biases: same block every step -> VMEM-resident
    out = pl.pallas_call(
        actor_kernel,
        out_shape=jax.ShapeDtypeStruct((b_pad, PAD_HEAD), jnp.float32),
        grid=(n_tiles,),
        in_specs=[
            pl.BlockSpec((tb, PAD_IN), lambda i: (i, 0)),    # x tile (bf16)
            pl.BlockSpec((PAD_IN, HID), const),              # w1 (padded, bf16)
            pl.BlockSpec((HID, HID), const),                 # w2 (bf16)
            pl.BlockSpec((HID, HID), const),                 # w3 (bf16)
            pl.BlockSpec((HID, PAD_HEAD), const),            # fused heads (bf16)
            pl.BlockSpec((BIAS_ROWS, HID), const),           # consolidated bias slab (f32)
        ],
        out_specs=pl.BlockSpec((tb, PAD_HEAD), lambda i: (i, 0)),
        compiler_params=pltpu.CompilerParams(
            dimension_semantics=("parallel",)),              # megacore batch split (v7x)
    )(x_pad, prepared["w1"], prepared["w2"], prepared["w3"],
      prepared["wh"], prepared["biases"])

    # log_std is already clamped in-kernel; wrapper is slice-only.
    mean = out[:B, :OUT_DIM]
    log_std = out[:B, OUT_DIM:2 * OUT_DIM]
    return mean, log_std


def actor_forward(state, prepared, *, tile_b=1024, num_cores=None):
    """state: (B, 39) float32. prepared: output of prepare_params.

    Returns (mean, log_std), each (B, 2) float32.
    """
    if num_cores is None:
        num_cores = _NUM_TENSORCORES
    B = state.shape[0]
    tb, n_tiles, b_pad = _select_batch_tiling(B, tile_b, num_cores)
    return _actor_forward_impl(state, prepared, tb=tb, n_tiles=n_tiles, b_pad=b_pad)


# ----------------------------------------------------------------------------
# Init + references.
# ----------------------------------------------------------------------------
def init_params(key):
    """PyTorch-Linear-style init (uniform(-1/sqrt(fan_in), 1/sqrt(fan_in)))."""
    def linear(k, fan_in, fan_out):
        kw, kb = jax.random.split(k)
        bound = 1.0 / jnp.sqrt(fan_in)
        w = jax.random.uniform(kw, (fan_in, fan_out), jnp.float32, -bound, bound)
        b = jax.random.uniform(kb, (fan_out,), jnp.float32, -bound, bound)
        return w, b

    k1, k2, k3, k4, k5 = jax.random.split(key, 5)
    w1, b1 = linear(k1, IN_DIM, HID)
    w2, b2 = linear(k2, HID, HID)
    w3, b3 = linear(k3, HID, HID)
    wm, bm = linear(k4, HID, OUT_DIM)
    ws, bs = linear(k5, HID, OUT_DIM)
    return dict(w1=w1, b1=b1, w2=w2, b2=b2, w3=w3, b3=b3,
                wm=wm, bm=bm, ws=ws, bs=bs)


def actor_forward_ref_f32(state, params):
    """Pure f32 reference of the PyTorch forward (semantic check)."""
    h = jnp.maximum(state @ params["w1"] + params["b1"], 0.0)
    h = jnp.maximum(h @ params["w2"] + params["b2"], 0.0)
    h = jnp.maximum(h @ params["w3"] + params["b3"], 0.0)
    mean = h @ params["wm"] + params["bm"]
    log_std = jnp.clip(h @ params["ws"] + params["bs"], LOG_SIG_MIN, LOG_SIG_MAX)
    return mean, log_std


def actor_forward_ref_mixed(state, prepared):
    """XLA reference that mimics the kernel's bf16-weight / f32-accum math."""
    B = state.shape[0]
    x = jnp.zeros((B, PAD_IN), jnp.bfloat16).at[:, :IN_DIM].set(state.astype(jnp.bfloat16))
    b = prepared["biases"]

    def layer(a, w, bias):
        return jnp.dot(a.astype(jnp.bfloat16), w,
                       preferred_element_type=jnp.float32) + bias

    h = jnp.maximum(layer(x, prepared["w1"], b[0:1, :]), 0.0)
    h = jnp.maximum(layer(h, prepared["w2"], b[1:2, :]), 0.0)
    h = jnp.maximum(layer(h, prepared["w3"], b[2:3, :]), 0.0)
    out = layer(h, prepared["wh"], b[3:4, :PAD_HEAD])
    mean = out[:, :OUT_DIM]
    log_std = jnp.clip(out[:, OUT_DIM:2 * OUT_DIM], LOG_SIG_MIN, LOG_SIG_MAX)
    return mean, log_std


if __name__ == "__main__":
    key = jax.random.PRNGKey(0)
    k_param, k_state, k_state2, k_state3 = jax.random.split(key, 4)

    params = init_params(k_param)
    prepared = prepare_params(params)          # one-time: pad/fuse/bf16-cast weights, pack biases

    # --- small inference-style batch (single tile, grid=(1,)) --------------
    B = 8
    state = jax.random.normal(k_state, (B, IN_DIM), jnp.float32)

    mean, log_std = actor_forward(state, prepared)
    jax.block_until_ready((mean, log_std))
    assert mean.shape == (B, OUT_DIM) and log_std.shape == (B, OUT_DIM)

    mean_mx, log_std_mx = actor_forward_ref_mixed(state, prepared)
    assert jnp.allclose(mean, mean_mx, atol=1e-3, rtol=1e-3)
    assert jnp.allclose(log_std, log_std_mx, atol=1e-3, rtol=1e-3)

    mean_f32, log_std_f32 = actor_forward_ref_f32(state, params)
    assert jnp.allclose(mean, mean_f32, atol=5e-2, rtol=5e-2)       # bf16-weight tolerance
    assert jnp.allclose(log_std, log_std_f32, atol=5e-2, rtol=5e-2)

    # --- multi-tile batch path (grid > 1, remainder padding <= 7 rows/tile)
    B2 = 200
    state2 = jax.random.normal(k_state2, (B2, IN_DIM), jnp.float32)
    mean2, log_std2 = actor_forward(state2, prepared, tile_b=64)     # grid = (4,), tb = 56
    jax.block_until_ready((mean2, log_std2))
    mean2_mx, log_std2_mx = actor_forward_ref_mixed(state2, prepared)
    assert mean2.shape == (B2, OUT_DIM) and log_std2.shape == (B2, OUT_DIM)
    assert jnp.allclose(mean2, mean2_mx, atol=1e-3, rtol=1e-3)
    assert jnp.allclose(log_std2, log_std2_mx, atol=1e-3, rtol=1e-3)

    # --- forced 2-TensorCore split path (v7x-style), hardware-independent --
    B3 = 520
    state3 = jax.random.normal(k_state3, (B3, IN_DIM), jnp.float32)
    mean3, log_std3 = actor_forward(state3, prepared, num_cores=2)   # grid = (2,), tb = 264
    jax.block_until_ready((mean3, log_std3))
    mean3_mx, log_std3_mx = actor_forward_ref_mixed(state3, prepared)
    assert mean3.shape == (B3, OUT_DIM) and log_std3.shape == (B3, OUT_DIM)
    assert jnp.allclose(mean3, mean3_mx, atol=1e-3, rtol=1e-3)
    assert jnp.allclose(log_std3, log_std3_mx, atol=1e-3, rtol=1e-3)

    # TODO(synk): `sample()` (Normal.rsample + tanh + NaN scrub) is host-side
    # stochastic glue, not part of the deterministic forward path; left out.
    print("KERNEL_OK")
</pallas_src>

<mosaic_0001>
module attributes {stable_mosaic.version = 11 : i64} {
  func.func @actor_kernel(%arg0: i32, %arg1: memref<8x128xbf16, #tpu.memory_space<vmem>>, %arg2: memref<128x512xbf16, #tpu.memory_space<vmem>>, %arg3: memref<512x512xbf16, #tpu.memory_space<vmem>>, %arg4: memref<512x512xbf16, #tpu.memory_space<vmem>>, %arg5: memref<512x128xbf16, #tpu.memory_space<vmem>>, %arg6: memref<8x512xf32, #tpu.memory_space<vmem>>, %arg7: memref<8x128xf32, #tpu.memory_space<vmem>>) attributes {dimension_semantics = [#tpu.dimension_semantics<parallel>], iteration_bounds = array<i64: 1>, scalar_prefetch = 0 : i64, scratch_operands = 0 : i64, tpu.core_type = #tpu.core_type<tc>, window_params = [{transform_indices = @transform_0, window_bounds = array<i64: 8, 128>}, {pipeline_mode = #tpu.pipeline_mode<synchronous>, transform_indices = @transform_1, window_bounds = array<i64: 128, 512>}, {pipeline_mode = #tpu.pipeline_mode<synchronous>, transform_indices = @transform_2, window_bounds = array<i64: 512, 512>}, {pipeline_mode = #tpu.pipeline_mode<synchronous>, transform_indices = @transform_3, window_bounds = array<i64: 512, 512>}, {pipeline_mode = #tpu.pipeline_mode<synchronous>, transform_indices = @transform_4, window_bounds = array<i64: 512, 128>}, {pipeline_mode = #tpu.pipeline_mode<synchronous>, transform_indices = @transform_5, window_bounds = array<i64: 8, 512>}, {transform_indices = @transform_6, window_bounds = array<i64: 8, 128>}]} {
    %c0 = arith.constant 0 : index
    %c0_0 = arith.constant 0 : index
    %0 = vector.load %arg1[%c0, %c0_0] : memref<8x128xbf16, #tpu.memory_space<vmem>>, vector<8x128xbf16>
    %c0_1 = arith.constant 0 : index
    %c0_2 = arith.constant 0 : index
    %1 = vector.load %arg2[%c0_1, %c0_2] : memref<128x512xbf16, #tpu.memory_space<vmem>>, vector<128x512xbf16>
    %cst = arith.constant dense<0.000000e+00> : vector<8x512xf32>
    %2 = tpu.matmul %0, %1, %cst {dimension_numbers = #tpu.dot_dimension_numbers<[1], [0], [0], [1], [0, 0, 1, 1], [], []>} : vector<8x128xbf16>, vector<128x512xbf16>, vector<8x512xf32> -> vector<8x512xf32>
    %c0_3 = arith.constant 0 : index
    %c0_4 = arith.constant 0 : index
    %3 = vector.load %arg6[%c0_3, %c0_4] : memref<8x512xf32, #tpu.memory_space<vmem>>, vector<1x512xf32>
    %4 = vector.broadcast %3 : vector<1x512xf32> to vector<8x512xf32>
    %5 = arith.addf %2, %4 : vector<8x512xf32>
    %cst_5 = arith.constant 0.000000e+00 : f32
    %6 = vector.broadcast %cst_5 : f32 to vector<8x512xf32>
    %7 = arith.maximumf %5, %6 : vector<8x512xf32>
    %8 = arith.truncf %7 : vector<8x512xf32> to vector<8x512xbf16>
    %c0_6 = arith.constant 0 : index
    %c0_7 = arith.constant 0 : index
    %9 = vector.load %arg3[%c0_6, %c0_7] : memref<512x512xbf16, #tpu.memory_space<vmem>>, vector<512x512xbf16>
    %cst_8 = arith.constant dense<0.000000e+00> : vector<8x512xf32>
    %10 = tpu.matmul %8, %9, %cst_8 {dimension_numbers = #tpu.dot_dimension_numbers<[1], [0], [0], [1], [0, 0, 1, 1], [], []>} : vector<8x512xbf16>, vector<512x512xbf16>, vector<8x512xf32> -> vector<8x512xf32>
    %c1 = arith.constant 1 : index
    %c0_9 = arith.constant 0 : index
    %11 = vector.load %arg6[%c1, %c0_9] : memref<8x512xf32, #tpu.memory_space<vmem>>, vector<1x512xf32>
    %12 = vector.broadcast %11 : vector<1x512xf32> to vector<8x512xf32>
    %13 = arith.addf %10, %12 : vector<8x512xf32>
    %cst_10 = arith.constant 0.000000e+00 : f32
    %14 = vector.broadcast %cst_10 : f32 to vector<8x512xf32>
    %15 = arith.maximumf %13, %14 : vector<8x512xf32>
    %16 = arith.truncf %15 : vector<8x512xf32> to vector<8x512xbf16>
    %c0_11 = arith.constant 0 : index
    %c0_12 = arith.constant 0 : index
    %17 = vector.load %arg4[%c0_11, %c0_12] : memref<512x512xbf16, #tpu.memory_space<vmem>>, vector<512x512xbf16>
    %cst_13 = arith.constant dense<0.000000e+00> : vector<8x512xf32>
    %18 = tpu.matmul %16, %17, %cst_13 {dimension_numbers = #tpu.dot_dimension_numbers<[1], [0], [0], [1], [0, 0, 1, 1], [], []>} : vector<8x512xbf16>, vector<512x512xbf16>, vector<8x512xf32> -> vector<8x512xf32>
    %c2 = arith.constant 2 : index
    %c0_14 = arith.constant 0 : index
    %19 = vector.load %arg6[%c2, %c0_14] : memref<8x512xf32, #tpu.memory_space<vmem>>, vector<1x512xf32>
    %20 = vector.broadcast %19 : vector<1x512xf32> to vector<8x512xf32>
    %21 = arith.addf %18, %20 : vector<8x512xf32>
    %cst_15 = arith.constant 0.000000e+00 : f32
    %22 = vector.broadcast %cst_15 : f32 to vector<8x512xf32>
    %23 = arith.maximumf %21, %22 : vector<8x512xf32>
    %24 = arith.truncf %23 : vector<8x512xf32> to vector<8x512xbf16>
    %c0_16 = arith.constant 0 : index
    %c0_17 = arith.constant 0 : index
    %25 = vector.load %arg5[%c0_16, %c0_17] : memref<512x128xbf16, #tpu.memory_space<vmem>>, vector<512x128xbf16>
    %cst_18 = arith.constant dense<0.000000e+00> : vector<8x128xf32>
    %26 = tpu.matmul %24, %25, %cst_18 {dimension_numbers = #tpu.dot_dimension_numbers<[1], [0], [0], [1], [0, 0, 1, 1], [], []>} : vector<8x512xbf16>, vector<512x128xbf16>, vector<8x128xf32> -> vector<8x128xf32>
    %c3 = arith.constant 3 : index
    %c0_19 = arith.constant 0 : index
    %27 = vector.load %arg6[%c3, %c0_19] : memref<8x512xf32, #tpu.memory_space<vmem>>, vector<1x128xf32>
    %28 = vector.broadcast %27 : vector<1x128xf32> to vector<8x128xf32>
    %29 = arith.addf %26, %28 : vector<8x128xf32>
    %30 = tpu.iota {dimensions = array<i32: 1>} : vector<8x128xi32>
    %c2_i32 = arith.constant 2 : i32
    %31 = vector.broadcast %c2_i32 : i32 to vector<8x128xi32>
    %32 = arith.cmpi sge, %30, %31 : vector<8x128xi32>
    %c4_i32 = arith.constant 4 : i32
    %33 = vector.broadcast %c4_i32 : i32 to vector<8x128xi32>
    %34 = arith.cmpi slt, %30, %33 : vector<8x128xi32>
    %35 = arith.andi %32, %34 : vector<8x128xi1>
    %cst_20 = arith.constant -2.000000e+01 : f32
    %cst_21 = arith.constant 2.000000e+00 : f32
    %36 = vector.broadcast %cst_20 : f32 to vector<8x128xf32>
    %37 = arith.maximumf %36, %29 : vector<8x128xf32>
    %38 = vector.broadcast %cst_21 : f32 to vector<8x128xf32>
    %39 = arith.minimumf %38, %37 : vector<8x128xf32>
    %40 = arith.select %35, %39, %29 : vector<8x128xi1>, vector<8x128xf32>
    %c0_22 = arith.constant 0 : index
    %c0_23 = arith.constant 0 : index
    %41 = vector.load %arg7[%c0_22, %c0_23] : memref<8x128xf32, #tpu.memory_space<vmem>>, vector<8x128xf32>
    tpu.vector_store %arg7[%c0_22, %c0_23], %40 {strides = array<i32>} : memref<8x128xf32, #tpu.memory_space<vmem>>, vector<8x128xf32>,
    return
  }
  func.func @transform_0(%arg0: i32) -> (i32, i32) {
    %c0_i32 = arith.constant 0 : i32
    %c0_i32_0 = arith.constant 0 : i32
    return %arg0, %c0_i32 : i32, i32
  }
  func.func @transform_1(%arg0: i32) -> (i32, i32) {
    %c0_i32 = arith.constant 0 : i32
    %c0_i32_0 = arith.constant 0 : i32
    %c0_i32_1 = arith.constant 0 : i32
    return %c0_i32, %c0_i32_0 : i32, i32
  }
  func.func @transform_2(%arg0: i32) -> (i32, i32) {
    %c0_i32 = arith.constant 0 : i32
    %c0_i32_0 = arith.constant 0 : i32
    %c0_i32_1 = arith.constant 0 : i32
    return %c0_i32, %c0_i32_0 : i32, i32
  }
  func.func @transform_3(%arg0: i32) -> (i32, i32) {
    %c0_i32 = arith.constant 0 : i32
    %c0_i32_0 = arith.constant 0 : i32
    %c0_i32_1 = arith.constant 0 : i32
    return %c0_i32, %c0_i32_0 : i32, i32
  }
  func.func @transform_4(%arg0: i32) -> (i32, i32) {
    %c0_i32 = arith.constant 0 : i32
    %c0_i32_0 = arith.constant 0 : i32
    %c0_i32_1 = arith.constant 0 : i32
    return %c0_i32, %c0_i32_0 : i32, i32
  }
  func.func @transform_5(%arg0: i32) -> (i32, i32) {
    %c0_i32 = arith.constant 0 : i32
    %c0_i32_0 = arith.constant 0 : i32
    %c0_i32_1 = arith.constant 0 : i32
    return %c0_i32, %c0_i32_0 : i32, i32
  }
  func.func @transform_6(%arg0: i32) -> (i32, i32) {
    %c0_i32 = arith.constant 0 : i32
    %c0_i32_0 = arith.constant 0 : i32
    return %arg0, %c0_i32 : i32, i32
  }
}

</mosaic_0001>

<bundles_post_ra>
// kernel: _actor_forward_impl.1
= control target key start
LH: loop header
LB: loop body
LE: loop exit
PB: predicated region body
PF: predicated region fallthrough
CT: control target
= control target key end

     0   :  { %11 = vsyncpa [#allocation3], 0  ;;  %s4549_s0 = inlined_call_operand.vmem [shape: bf16[8,128], index: 0, kind: input, shape index: {}]   ;;  %s4550_s1 = inlined_call_operand.hbm [shape: bf16[128,512], index: 1, kind: input, shape index: {}]   ;;  %s4551_s2 = inlined_call_operand.hbm [shape: bf16[512,512], index: 2, kind: input, shape index: {}]   ;;  %s4552_s3 = inlined_call_operand.hbm [shape: bf16[512,512], index: 3, kind: input, shape index: {}]   ;;  %s4553_s4 = inlined_call_operand.hbm [shape: bf16[512,128], index: 4, kind: input, shape index: {}]   ;;  %s4554_s5 = inlined_call_operand.hbm [shape: f32[8,512], index: 5, kind: input, shape index: {}]   ;;  %s4555_s6 = inlined_call_operand.vmem [shape: f32[8,128], index: 6, kind: output, shape index: {}]  }
   0x1   :  { %12 = vsyncpa [#allocation5], 0 }
   0x2   :  { %13 = vsyncpa [#allocation8], 0  ;;  %s33_s23 = sshll.u32 %s4551_s2, 4  ;;  %s4412_s24 = smov [#allocation4]   ;;  %s34_s23 = int_to_ptr.hbm [resolvable:$true] %s33_s23 }
   0x3   :  { %s35_s25 = sshll.u32 %s4412_s24, 4  ;;  %s59_s28 = sshll.u32 %s4553_s4, 4  ;;  %s36_s25 = int_to_ptr.vmem [resolvable:$true] %s35_s25  ;;  %s60_s28 = int_to_ptr.hbm [resolvable:$true] %s59_s28 }
   0x4   :  { %s4413_s29 = smov 256   ;;  %s4414_s30 = smov 16  }
   0x5   :  { %41 = dma.hbm_to_vmem [thread:$0]  %s34_s23, 16384, %s36_s25, [#allocation5], %s4413_s29, %s4413_s29, %s4414_s30  }
   0x6   :  { %s4415_s7 = smov [#allocation7]   ;;  %s4416_s9 = smov 64  }
   0x7   :  { %s61_s8 = sshll.u32 %s4415_s7, 4  ;;  %s4417_s10 = smov 4   ;;  %s62_s8 = int_to_ptr.vmem [resolvable:$true] %s61_s8 }
   0x8   :  { %67 = dma.hbm_to_vmem [thread:$0]  %s60_s28, 4096, %s62_s8, [#allocation8], %s4416_s9, %s4416_s9, %s4417_s10  }
   0x9   :  { %s20_s12 = sshll.u32 %s4550_s1, 4  ;;  %s4418_s13 = smov [#allocation2]   ;;  %s21_s12 = int_to_ptr.hbm [resolvable:$true] %s20_s12 }
   0xa   :  { %s22_s14 = sshll.u32 %s4418_s13, 4  ;;  %s46_s16 = sshll.u32 %s4552_s3, 4  ;;  %s23_s14 = int_to_ptr.vmem [resolvable:$true] %s22_s14  ;;  %s47_s16 = int_to_ptr.hbm [resolvable:$true] %s46_s16 }
   0xb   :  { %28 = dma.hbm_to_vmem [thread:$0]  %s21_s12, 4096, %s23_s14, [#allocation3], %s4413_s29, %s4413_s29, %s4414_s30  }
   0xc   :  { %s4419_s17 = smov [#allocation6]   ;;  %s73_s21 = sshll.u32 %s4554_s5, 4  ;;  %s74_s21 = int_to_ptr.hbm [resolvable:$true] %s73_s21 }
   0xd   :  { %s48_s18 = sshll.u32 %s4419_s17, 4  ;;  %s4420_s1 = smov [#allocation9]   ;;  %s49_s18 = int_to_ptr.vmem [resolvable:$true] %s48_s18 }
   0xe   :  { %54 = dma.hbm_to_vmem [thread:$0]  %s47_s16, 16384, %s49_s18, [#allocation5], %s4413_s29, %s4413_s29, %s4414_s30  }
   0xf   :  { %s75_s22 = sshll.u32 %s4420_s1, 4  ;;  %s76_s22 = int_to_ptr.vmem [resolvable:$true] %s75_s22 }
  0x10   :  { %78 = dma.hbm_to_vmem [thread:$0]  %s74_s21, 512, %s76_s22, [#allocation8]  }
  0x11   :  { %4406 = dma.done.wait [#allocation3], 4096  }
  0x12   :  { %4407 = vsyncadd [#allocation3], 4294963200 }
  0x13   :  { %4408 = dma.done.wait [#allocation5], 32768  }
  0x14   :  { %4409 = vsyncadd [#allocation5], 4294934528 }
  0x15   :  { %4410 = dma.done.wait [#allocation8], 4608  }
  0x16   :  { %4411 = vsyncadd [#allocation8], 4294962688  ;;  %v2791_v0 = vld [vmem:[#allocation2 + $0xe0] sm:$0xf]  ;;  %v3987_v1 = vld [vmem:[#allocation2 + $0xec] sm:$0xf0] }
  0x17   :  { %v3985_v2 = vld [vmem:[#allocation2 + $0xe4] sm:$0xf]  ;;  %v2792_v3 = vor.u32 %v3987_v1, %v2791_v0  ;;  %v2793_v4 = vld [vmem:[#allocation2 + $0xf0] sm:$0xf0]  ;;  %v2799_v5 = vld [vmem:[#allocation2 + $0xe8] sm:$0xf] }
  0x18   :  { %v3988_v6 = vld [vmem:[#allocation2 + $0xf4] sm:$0xf0]  ;;  %v2796_v7 = vor.u32 %v3985_v2, %v2793_v4  ;;  %v3986_v9 = vld [vmem:[#allocation2 + $0xec] sm:$0xf]  ;;  %v2801_v10 = vld [vmem:[#allocation2 + $0xf8] sm:$0xf0] }
  0x19   :  { %v2800_v8 = vor.u32 %v3988_v6, %v2799_v5  ;;  %v2775_v11 = vld [vmem:[#allocation2 + $0xc0] sm:$0xf]  ;;  %302 = vmatpush.bf16.msra.mxu0 %v2792_v3  ;;  %v2804_v12 = vor.u32 %v3986_v9, %v2801_v10  ;;  %v3983_v13 = vld [vmem:[#allocation2 + $0xcc] sm:$0xf0]  ;;  %v3981_v14 = vld [vmem:[#allocation2 + $0xc4] sm:$0xf] }
  0x1a   :  { %v2777_v15 = vld [vmem:[#allocation2 + $0xd0] sm:$0xf0]  ;;  %315 = vmatpush.bf16.msra.mxu1 %v2796_v7  ;;  %v2776_v16 = vor.u32 %v3983_v13, %v2775_v11  ;;  %v2783_v18 = vld [vmem:[#allocation2 + $0xc8] sm:$0xf]  ;;  %v3984_v19 = vld [vmem:[#allocation2 + $0xd4] sm:$0xf0] }
  0x1b   :  { %328 = vmatpush.bf16.msra.mxu2 %v2800_v8  ;;  %v2780_v17 = vor.u32 %v3981_v14, %v2777_v15  ;;  %v3982_v20 = vld [vmem:[#allocation2 + $0xcc] sm:$0xf]  ;;  %341 = vmatpush.bf16.msra.mxu3 %v2804_v12  ;;  %v2784_v21 = vor.u32 %v3984_v19, %v2783_v18  ;;  %v2785_v22 = vld [vmem:[#allocation2 + $0xd8] sm:$0xf0]  ;;  %v2759_v23 = vld [vmem:[#allocation2 + $0xa0] sm:$0xf] }
  0x1c   :  { %v3979_v24 = vld [vmem:[#allocation2 + $0xac] sm:$0xf0]  ;;  %v2788_v25 = vor.u32 %v3982_v20, %v2785_v22  ;;  %v3977_v26 = vld [vmem:[#allocation2 + $0xa4] sm:$0xf]  ;;  %v2761_v27 = vld [vmem:[#allocation2 + $0xb0] sm:$0xf0] }
  0x1d   :  { %v2767_v28 = vld [vmem:[#allocation2 + $0xa8] sm:$0xf]  ;;  %303 = vmatpush.bf16.msra.mxu0 %v2776_v16  ;;  %v2760_v29 = vor.u32 %v3979_v24, %v2759_v23  ;;  %v3980_v30 = vld [vmem:[#allocation2 + $0xb4] sm:$0xf0]  ;;  %v3978_v31 = vld [vmem:[#allocation2 + $0xac] sm:$0xf]  ;;  %v2764_v33 = vor.u32 %v3977_v26, %v2761_v27 }
  0x1e   :  { %v2769_v32 = vld [vmem:[#allocation2 + $0xb8] sm:$0xf0]  ;;  %316 = vmatpush.bf16.msra.mxu1 %v2780_v17  ;;  %v2768_v34 = vor.u32 %v3980_v30, %v2767_v28  ;;  %v2743_v35 = vld [vmem:[#allocation2 + $0x80] sm:$0xf]  ;;  %v3975_v36 = vld [vmem:[#allocation2 + $0x8c] sm:$0xf0] }
  0x1f   :  { %329 = vmatpush.bf16.msra.mxu2 %v2784_v21  ;;  %v3973_v37 = vld [vmem:[#allocation2 + $0x84] sm:$0xf]  ;;  %342 = vmatpush.bf16.msra.mxu3 %v2788_v25  ;;  %v2772_v38 = vor.u32 %v3978_v31, %v2769_v32  ;;  %v2745_v39 = vld [vmem:[#allocation2 + $0x90] sm:$0xf0]  ;;  %v2751_v40 = vld [vmem:[#allocation2 + $0x88] sm:$0xf]  ;;  %v2744_v44 = vor.u32 %v3975_v36, %v2743_v35 }
  0x20   :  { %v3976_v41 = vld [vmem:[#allocation2 + $0x94] sm:$0xf0]  ;;  %v3974_v42 = vld [vmem:[#allocation2 + $0x8c] sm:$0xf]  ;;  %v2753_v43 = vld [vmem:[#allocation2 + $0x98] sm:$0xf0]  ;;  %v2748_v45 = vor.u32 %v3973_v37, %v2745_v39 }
  0x21   :  { %304 = vmatpush.bf16.msra.mxu0 %v2760_v29  ;;  %v2752_v46 = vor.u32 %v3976_v41, %v2751_v40  ;;  %v2727_v47 = vld [vmem:[#allocation2 + $0x60] sm:$0xf]  ;;  %v3971_v48 = vld [vmem:[#allocation2 + $0x6c] sm:$0xf0]  ;;  %v3969_v49 = vld [vmem:[#allocation2 + $0x64] sm:$0xf]  ;;  %v2756_v50 = vor.u32 %v3974_v42, %v2753_v43 }
  0x22   :  { %317 = vmatpush.bf16.msra.mxu1 %v2764_v33  ;;  %v2729_v51 = vld [vmem:[#allocation2 + $0x70] sm:$0xf0]  ;;  %v2735_v52 = vld [vmem:[#allocation2 + $0x68] sm:$0xf]  ;;  %v3972_v53 = vld [vmem:[#allocation2 + $0x74] sm:$0xf0]  ;;  %v2728_v56 = vor.u32 %v3971_v48, %v2727_v47 }
  0x23   :  { %330 = vmatpush.bf16.msra.mxu2 %v2768_v34  ;;  %343 = vmatpush.bf16.msra.mxu3 %v2772_v38  ;;  %v3970_v54 = vld [vmem:[#allocation2 + $0x6c] sm:$0xf]  ;;  %v2737_v55 = vld [vmem:[#allocation2 + $0x78] sm:$0xf0]  ;;  %v2732_v57 = vor.u32 %v3969_v49, %v2729_v51  ;;  %v2736_v58 = vor.u32 %v3972_v53, %v2735_v52  ;;  %v2711_v59 = vld [vmem:[#allocation2 + $0x40] sm:$0xf] }
  0x24   :  { %v3967_v60 = vld [vmem:[#allocation2 + $0x4c] sm:$0xf0]  ;;  %v3965_v61 = vld [vmem:[#allocation2 + $0x44] sm:$0xf]  ;;  %v2740_v62 = vor.u32 %v3970_v54, %v2737_v55  ;;  %v2713_v63 = vld [vmem:[#allocation2 + $0x50] sm:$0xf0] }
  0x25   :  { %305 = vmatpush.bf16.msra.mxu0 %v2744_v44  ;;  %v2719_v0 = vld [vmem:[#allocation2 + $0x48] sm:$0xf]  ;;  %v3968_v1 = vld [vmem:[#allocation2 + $0x54] sm:$0xf0]  ;;  %v3966_v2 = vld [vmem:[#allocation2 + $0x4c] sm:$0xf]  ;;  %v2712_v4 = vor.u32 %v3967_v60, %v2711_v59  ;;  %v2716_v5 = vor.u32 %v3965_v61, %v2713_v63 }
  0x26   :  { %318 = vmatpush.bf16.msra.mxu1 %v2748_v45  ;;  %v2721_v3 = vld [vmem:[#allocation2 + $0x58] sm:$0xf0]  ;;  %v2720_v6 = vor.u32 %v3968_v1, %v2719_v0  ;;  %v2695_v7 = vld [vmem:[#allocation2 + $0x20] sm:$0xf]  ;;  %v3963_v8 = vld [vmem:[#allocation2 + $0x2c] sm:$0xf0] }
  0x27   :  { %331 = vmatpush.bf16.msra.mxu2 %v2752_v46  ;;  %344 = vmatpush.bf16.msra.mxu3 %v2756_v50  ;;  %v3961_v9 = vld [vmem:[#allocation2 + $0x24] sm:$0xf]  ;;  %v2724_v10 = vor.u32 %v3966_v2, %v2721_v3  ;;  %v2697_v11 = vld [vmem:[#allocation2 + $0x30] sm:$0xf0]  ;;  %v2703_v12 = vld [vmem:[#allocation2 + $0x28] sm:$0xf]  ;;  %v2696_v16 = vor.u32 %v3963_v8, %v2695_v7 }
  0x28   :  { %v3964_v13 = vld [vmem:[#allocation2 + $0x34] sm:$0xf0]  ;;  %v3962_v14 = vld [vmem:[#allocation2 + $0x2c] sm:$0xf]  ;;  %v2705_v15 = vld [vmem:[#allocation2 + $0x38] sm:$0xf0]  ;;  %v2700_v18 = vor.u32 %v3961_v9, %v2697_v11 }
  0x29   :  { %306 = vmatpush.bf16.msra.mxu0 %v2728_v56  ;;  %v2679_v17 = vld [vmem:[#allocation2] sm:$0xf]  ;;  %v2704_v19 = vor.u32 %v3964_v13, %v2703_v12  ;;  %v3959_v20 = vld [vmem:[#allocation2 + $0xc] sm:$0xf0]  ;;  %v3957_v21 = vld [vmem:[#allocation2 + $0x4] sm:$0xf]  ;;  %v2708_v23 = vor.u32 %v3962_v14, %v2705_v15 }
  0x2a   :  { %319 = vmatpush.bf16.msra.mxu1 %v2732_v57  ;;  %v2681_v22 = vld [vmem:[#allocation2 + $0x10] sm:$0xf0]  ;;  %v2687_v24 = vld [vmem:[#allocation2 + $0x8] sm:$0xf]  ;;  %v3960_v25 = vld [vmem:[#allocation2 + $0x14] sm:$0xf0]  ;;  %v2680_v30 = vor.u32 %v3959_v20, %v2679_v17 }
  0x2b   :  { %332 = vmatpush.bf16.msra.mxu2 %v2736_v58  ;;  %345 = vmatpush.bf16.msra.mxu3 %v2740_v62  ;;  %v3958_v26 = vld [vmem:[#allocation2 + $0xc] sm:$0xf]  ;;  %v2689_v27 = vld [vmem:[#allocation2 + $0x18] sm:$0xf0]  ;;  %v2919_v28 = vld [vmem:[#allocation4 + $0xe0] sm:$0xf]  ;;  %v2684_v33 = vor.u32 %v3957_v21, %v2681_v22  ;;  %v2688_v34 = vor.u32 %v3960_v25, %v2687_v24 }
  0x2c   :  { %v4019_v29 = vld [vmem:[#allocation4 + $0xec] sm:$0xf0]  ;;  %v3047_v31 = vld [vmem:[#allocation4 + $0x1e0] sm:$0xf]  ;;  %v2692_v35 = vor.u32 %v3958_v26, %v2689_v27 }
  0x2d   :  { %307 = vmatpush.bf16.msra.mxu0 %v2712_v4  ;;  %v4051_v32 = vld [vmem:[#allocation4 + $0x1ec] sm:$0xf0]  ;;  %v2920_v36 = vor.u32 %v4019_v29, %v2919_v28  ;;  %v2903_v37 = vld [vmem:[#allocation4 + $0xc0] sm:$0xf] }
  0x2e   :  { %320 = vmatpush.bf16.msra.mxu1 %v2716_v5  ;;  %v3175_v38 = vld [vmem:[#allocation4 + $0x2e0] sm:$0xf]  ;;  %v4083_v39 = vld [vmem:[#allocation4 + $0x2ec] sm:$0xf0]  ;;  %v3048_v40 = vor.u32 %v4051_v32, %v3047_v31 }
  0x2f   :  { %333 = vmatpush.bf16.msra.mxu2 %v2720_v6  ;;  %346 = vmatpush.bf16.msra.mxu3 %v2724_v10  ;;  %v4015_v41 = vld [vmem:[#allocation4 + $0xcc] sm:$0xf0]  ;;  %v3303_v42 = vld [vmem:[#allocation4 + $0x3e0] sm:$0xf]  ;;  %v3176_v47 = vor.u32 %v4083_v39, %v3175_v38 }
  0x30   :  { %v4115_v43 = vld [vmem:[#allocation4 + $0x3ec] sm:$0xf0]  ;;  %v99_v44 = vld [vmem:[%s4549_s0] sm:$0xf]  ;;  %v2904_v48 = vor.u32 %v4015_v41, %v2903_v37 }
  0x31   :  { %308 = vmatpush.bf16.msra.mxu0 %v2696_v16  ;;  %v3031_v45 = vld [vmem:[#allocation4 + $0x1c0] sm:$0xf]  ;;  %v4047_v46 = vld [vmem:[#allocation4 + $0x1cc] sm:$0xf0]  ;;  %v3304_v49 = vor.u32 %v4115_v43, %v3303_v42 }
  0x32   :  { %321 = vmatpush.bf16.msra.mxu1 %v2700_v18  ;;  %v2887_v50 = vld [vmem:[#allocation4 + $0xa0] sm:$0xf]  ;;  %v4079_v52 = vld [vmem:[#allocation4 + $0x2cc] sm:$0xf0]  ;;  %v3032_v53 = vor.u32 %v4047_v46, %v3031_v45 }
  0x33   :  { %334 = vmatpush.bf16.msra.mxu2 %v2704_v19  ;;  %347 = vmatpush.bf16.msra.mxu3 %v2708_v23  ;;  %v3159_v51 = vld [vmem:[#allocation4 + $0x2c0] sm:$0xf]  ;;  %v4011_v54 = vld [vmem:[#allocation4 + $0xac] sm:$0xf0] }
  0x34   :  { %v3287_v55 = vld [vmem:[#allocation4 + $0x3c0] sm:$0xf]  ;;  %v4111_v56 = vld [vmem:[#allocation4 + $0x3cc] sm:$0xf0]  ;;  %v3160_v59 = vor.u32 %v4079_v52, %v3159_v51  ;;  %v2888_v60 = vor.u32 %v4011_v54, %v2887_v50 }
  0x35   :  { %309 = vmatpush.bf16.msra.mxu0 %v2680_v30  ;;  %v3015_v57 = vld [vmem:[#allocation4 + $0x1a0] sm:$0xf]  ;;  %v4043_v58 = vld [vmem:[#allocation4 + $0x1ac] sm:$0xf0]  ;;  %v3288_v61 = vor.u32 %v4111_v56, %v3287_v55  ;;  %v4017_v55 = vld [vmem:[#allocation4 + $0xe4] sm:$0xf] }
  0x36   :  { %322 = vmatpush.bf16.msra.mxu1 %v2684_v33  ;;  %v2871_v62 = vld [vmem:[#allocation4 + $0x80] sm:$0xf]  ;;  %v4075_v0 = vld [vmem:[#allocation4 + $0x2ac] sm:$0xf0]  ;;  %v3016_v1 = vor.u32 %v4043_v58, %v3015_v57  ;;  %v2921_v56 = vld [vmem:[#allocation4 + $0xf0] sm:$0xf0] }
  0x37   :  { %335 = vmatpush.bf16.msra.mxu2 %v2688_v34  ;;  %348 = vmatpush.bf16.msra.mxu3 %v2692_v35  ;;  %v3143_v63 = vld [vmem:[#allocation4 + $0x2a0] sm:$0xf]  ;;  %v4007_v2 = vld [vmem:[#allocation4 + $0x8c] sm:$0xf0]  ;;  %v4049_v57 = vld [vmem:[#allocation4 + $0x1e4] sm:$0xf] }
  0x38   :  { %310 = vmatmul.bf16.vlgmr.msra.gmra.mxu0 %v99_v44  ;;  %v3271_v3 = vld [vmem:[#allocation4 + $0x3a0] sm:$0xf]  ;;  %v4107_v4 = vld [vmem:[#allocation4 + $0x3ac] sm:$0xf0]  ;;  %v3144_v7 = vor.u32 %v4075_v0, %v3143_v63  ;;  %v2872_v8 = vor.u32 %v4007_v2, %v2871_v62  ;;  %v3049_v58 = vld [vmem:[#allocation4 + $0x1f0] sm:$0xf0] }
  0x39   :  { %1141 = vmatpush.bf16.msrb.mxu0 %v2920_v36  ;;  %323 = vmatmul.bf16.vlgmr.msra.gmra.mxu1 %v99_v44  ;;  %v2999_v5 = vld [vmem:[#allocation4 + $0x180] sm:$0xf]  ;;  %v4039_v6 = vld [vmem:[#allocation4 + $0x18c] sm:$0xf0]  ;;  %v3272_v9 = vor.u32 %v4107_v4, %v3271_v3  ;;  %v4013_v62 = vld [vmem:[#allocation4 + $0xc4] sm:$0xf]  ;;  %v2924_v3 = vor.u32 %v4017_v55, %v2921_v56 }
  0x3a   :  { %1154 = vmatpush.bf16.msrb.mxu1 %v3048_v40  ;;  %336 = vmatmul.bf16.vlgmr.msra.gmra.mxu2 %v99_v44  ;;  %v2855_v10 = vld [vmem:[#allocation4 + $0x60] sm:$0xf]  ;;  %v4071_v12 = vld [vmem:[#allocation4 + $0x28c] sm:$0xf0]  ;;  %v3000_v13 = vor.u32 %v4039_v6, %v2999_v5  ;;  %v4081_v5 = vld [vmem:[#allocation4 + $0x2e4] sm:$0xf] }
  0x3b   :  { %349 = vmatmul.bf16.vlgmr.msra.gmra.mxu3 %v99_v44  ;;  %1167 = vmatpush.bf16.msrb.mxu2 %v3176_v47  ;;  %v3127_v11 = vld [vmem:[#allocation4 + $0x280] sm:$0xf]  ;;  %v4003_v14 = vld [vmem:[#allocation4 + $0x6c] sm:$0xf0]  ;;  %v3177_v6 = vld [vmem:[#allocation4 + $0x2f0] sm:$0xf0] }
  0x3c   :  { %1180 = vmatpush.bf16.msrb.mxu3 %v3304_v49  ;;  %v3255_v15 = vld [vmem:[#allocation4 + $0x380] sm:$0xf]  ;;  %v4103_v16 = vld [vmem:[#allocation4 + $0x38c] sm:$0xf0]  ;;  %v3128_v19 = vor.u32 %v4071_v12, %v3127_v11  ;;  %v2856_v20 = vor.u32 %v4003_v14, %v2855_v10  ;;  %v3305_v10 = vld [vmem:[#allocation4 + $0x3f0] sm:$0xf0] }
  0x3d   :  { %1142 = vmatpush.bf16.msrb.mxu0 %v2904_v48  ;;  %v2983_v17 = vld [vmem:[#allocation4 + $0x160] sm:$0xf]  ;;  %v4035_v18 = vld [vmem:[#allocation4 + $0x16c] sm:$0xf0]  ;;  %v3256_v21 = vor.u32 %v4103_v16, %v3255_v15  ;;  %v4045_v11 = vld [vmem:[#allocation4 + $0x1c4] sm:$0xf]  ;;  %v3180_v15 = vor.u32 %v4081_v5, %v3177_v6 }
  0x3e   :  { %1155 = vmatpush.bf16.msrb.mxu1 %v3032_v53  ;;  %v2839_v22 = vld [vmem:[#allocation4 + $0x40] sm:$0xf]  ;;  %v4067_v24 = vld [vmem:[#allocation4 + $0x26c] sm:$0xf0]  ;;  %v2984_v25 = vor.u32 %v4035_v18, %v2983_v17  ;;  %v3033_v12 = vld [vmem:[#allocation4 + $0x1d0] sm:$0xf0] }
  0x3f   :  { %1168 = vmatpush.bf16.msrb.mxu2 %v3160_v59  ;;  %v3111_v23 = vld [vmem:[#allocation4 + $0x260] sm:$0xf]  ;;  %v3999_v26 = vld [vmem:[#allocation4 + $0x4c] sm:$0xf0]  ;;  %v4009_v18 = vld [vmem:[#allocation4 + $0xa4] sm:$0xf] }
  0x40   :  { %1181 = vmatpush.bf16.msrb.mxu3 %v3288_v61  ;;  %v3239_v27 = vld [vmem:[#allocation4 + $0x360] sm:$0xf]  ;;  %v4099_v28 = vld [vmem:[#allocation4 + $0x36c] sm:$0xf0]  ;;  %v3112_v31 = vor.u32 %v4067_v24, %v3111_v23  ;;  %v2840_v32 = vor.u32 %v3999_v26, %v2839_v22  ;;  %v2889_v22 = vld [vmem:[#allocation4 + $0xb0] sm:$0xf0] }
  0x41   :  { %1143 = vmatpush.bf16.msrb.mxu0 %v2888_v60  ;;  %v2967_v29 = vld [vmem:[#allocation4 + $0x140] sm:$0xf]  ;;  %v4031_v30 = vld [vmem:[#allocation4 + $0x14c] sm:$0xf0]  ;;  %v3240_v33 = vor.u32 %v4099_v28, %v3239_v27  ;;  %v4109_v23 = vld [vmem:[#allocation4 + $0x3c4] sm:$0xf]  ;;  %v2892_v28 = vor.u32 %v4009_v18, %v2889_v22 }
  0x42   :  { %1156 = vmatpush.bf16.msrb.mxu1 %v3016_v1  ;;  %v2823_v34 = vld [vmem:[#allocation4 + $0x20] sm:$0xf]  ;;  %v4063_v36 = vld [vmem:[#allocation4 + $0x24c] sm:$0xf0]  ;;  %v2968_v37 = vor.u32 %v4031_v30, %v2967_v29  ;;  %v3289_v24 = vld [vmem:[#allocation4 + $0x3d0] sm:$0xf0] }
  0x43   :  { %1169 = vmatpush.bf16.msrb.mxu2 %v3144_v7  ;;  %v3095_v35 = vld [vmem:[#allocation4 + $0x240] sm:$0xf]  ;;  %v3995_v38 = vld [vmem:[#allocation4 + $0x2c] sm:$0xf0]  ;;  %v3052_v7 = vor.u32 %v4049_v57, %v3049_v58  ;;  %v3017_v26 = vld [vmem:[#allocation4 + $0x1b0] sm:$0xf0]  ;;  %v3292_v29 = vor.u32 %v4109_v23, %v3289_v24 }
  0x44   :  { %1182 = vmatpush.bf16.msrb.mxu3 %v3272_v9  ;;  %v3223_v39 = vld [vmem:[#allocation4 + $0x340] sm:$0xf]  ;;  %v4095_v40 = vld [vmem:[#allocation4 + $0x34c] sm:$0xf0]  ;;  %v3096_v43 = vor.u32 %v4063_v36, %v3095_v35  ;;  %v2824_v45 = vor.u32 %v3995_v38, %v2823_v34  ;;  %v4113_v9 = vld [vmem:[#allocation4 + $0x3e4] sm:$0xf] }
  0x45   :  { %1144 = vmatpush.bf16.msrb.mxu0 %v2872_v8  ;;  %v2951_v41 = vld [vmem:[#allocation4 + $0x120] sm:$0xf]  ;;  %v4027_v42 = vld [vmem:[#allocation4 + $0x12c] sm:$0xf0]  ;;  %v3224_v46 = vor.u32 %v4095_v40, %v3223_v39  ;;  %v2905_v8 = vld [vmem:[#allocation4 + $0xd0] sm:$0xf0]  ;;  %v3308_v17 = vor.u32 %v4113_v9, %v3305_v10 }
  0x46   :  { %1157 = vmatpush.bf16.msrb.mxu1 %v3000_v13  ;;  %v2807_v44 = vld [vmem:[#allocation4] sm:$0xf]  ;;  %v3991_v47 = vld [vmem:[#allocation4 + $0xc] sm:$0xf0]  ;;  %v2952_v50 = vor.u32 %v4027_v42, %v2951_v41  ;;  %v2908_v16 = vor.u32 %v4013_v62, %v2905_v8  ;;  %v4005_v30 = vld [vmem:[#allocation4 + $0x84] sm:$0xf] }
  0x47   :  { %1170 = vmatpush.bf16.msrb.mxu2 %v3128_v19  ;;  %v3079_v48 = vld [vmem:[#allocation4 + $0x220] sm:$0xf]  ;;  %v4059_v49 = vld [vmem:[#allocation4 + $0x22c] sm:$0xf0]  ;;  %v2808_v60 = vor.u32 %v3991_v47, %v2807_v44  ;;  %v4077_v19 = vld [vmem:[#allocation4 + $0x2c4] sm:$0xf] }
  0x48   :  { %1183 = vmatpush.bf16.msrb.mxu3 %v3256_v21  ;;  %v2935_v51 = vld [vmem:[#allocation4 + $0x100] sm:$0xf]  ;;  %v4091_v53 = vld [vmem:[#allocation4 + $0x32c] sm:$0xf0]  ;;  %v3080_v59 = vor.u32 %v4059_v49, %v3079_v48  ;;  %v3036_v21 = vor.u32 %v4045_v11, %v3033_v12  ;;  %v2873_v34 = vld [vmem:[#allocation4 + $0x90] sm:$0xf0] }
  0x49   :  { %1145 = vmatpush.bf16.msrb.mxu0 %v2856_v20  ;;  %v3207_v52 = vld [vmem:[#allocation4 + $0x320] sm:$0xf]  ;;  %v4023_v54 = vld [vmem:[#allocation4 + $0x10c] sm:$0xf0]  ;;  %v3161_v20 = vld [vmem:[#allocation4 + $0x2d0] sm:$0xf0]  ;;  %v2876_v40 = vor.u32 %v4005_v30, %v2873_v34 }
  0x4a   :  { %1158 = vmatpush.bf16.msrb.mxu1 %v2984_v25  ;;  %v3208_v61 = vor.u32 %v4091_v53, %v3207_v52  ;;  %v3063_v63 = vld [vmem:[#allocation4 + $0x200] sm:$0xf]  ;;  %v4055_v0 = vld [vmem:[#allocation4 + $0x20c] sm:$0xf0]  ;;  %v2936_v2 = vor.u32 %v4023_v54, %v2935_v51  ;;  %v4041_v25 = vld [vmem:[#allocation4 + $0x1a4] sm:$0xf]  ;;  %v3164_v27 = vor.u32 %v4077_v19, %v3161_v20 }
  0x4b   :  { %1171 = vmatpush.bf16.msrb.mxu2 %v3112_v31  ;;  %v3191_v1 = vld [vmem:[#allocation4 + $0x300] sm:$0xf]  ;;  %v4087_v4 = vld [vmem:[#allocation4 + $0x30c] sm:$0xf0]  ;;  %v3064_v13 = vor.u32 %v4055_v0, %v3063_v63  ;;  %v4073_v31 = vld [vmem:[#allocation4 + $0x2a4] sm:$0xf] }
  0x4c   :  { %1184 = vmatpush.bf16.msrb.mxu3 %v3240_v33  ;;  %v3192_v14 = vor.u32 %v4087_v4, %v3191_v1  ;;  %v3020_v33 = vor.u32 %v4041_v25, %v3017_v26  ;;  %v4105_v35 = vld [vmem:[#allocation4 + $0x3a4] sm:$0xf]  ;;  %v3273_v36 = vld [vmem:[#allocation4 + $0x3b0] sm:$0xf0] }
  0x4d   :  { %1146 = vmatpush.bf16.msrb.mxu0 %v2840_v32  ;;  %v3145_v32 = vld [vmem:[#allocation4 + $0x2b0] sm:$0xf0]  ;;  %v3276_v41 = vor.u32 %v4105_v35, %v3273_v36  ;;  %v4001_v42 = vld [vmem:[#allocation4 + $0x64] sm:$0xf] }
  0x4e   :  { %1159 = vmatpush.bf16.msrb.mxu1 %v2968_v37  ;;  %v4037_v37 = vld [vmem:[#allocation4 + $0x184] sm:$0xf]  ;;  %v3001_v38 = vld [vmem:[#allocation4 + $0x190] sm:$0xf0]  ;;  %v3148_v39 = vor.u32 %v4073_v31, %v3145_v32 }
  0x4f   :  { %1172 = vmatpush.bf16.msrb.mxu2 %v3096_v43  ;;  %v4069_v43 = vld [vmem:[#allocation4 + $0x284] sm:$0xf]  ;;  %v3129_v44 = vld [vmem:[#allocation4 + $0x290] sm:$0xf0] }
  0x50   :  { %1185 = vmatpush.bf16.msrb.mxu3 %v3224_v46  ;;  %v2857_v46 = vld [vmem:[#allocation4 + $0x70] sm:$0xf0]  ;;  %v4101_v47 = vld [vmem:[#allocation4 + $0x384] sm:$0xf]  ;;  %v3132_v51 = vor.u32 %v4069_v43, %v3129_v44  ;;  %v4052_v43 = vld [vmem:[#allocation4 + $0x1f4] sm:$0xf0] }
  0x51   :  { %1147 = vmatpush.bf16.msrb.mxu0 %v2824_v45  ;;  %v3004_v45 = vor.u32 %v4037_v37, %v3001_v38  ;;  %v3257_v48 = vld [vmem:[#allocation4 + $0x390] sm:$0xf0]  ;;  %v4033_v49 = vld [vmem:[#allocation4 + $0x164] sm:$0xf]  ;;  %v2860_v52 = vor.u32 %v4001_v42, %v2857_v46  ;;  %v3055_v42 = vld [vmem:[#allocation4 + $0x1e8] sm:$0xf] }
  0x52   :  { %1160 = vmatpush.bf16.msrb.mxu1 %v2952_v50  ;;  %v2985_v50 = vld [vmem:[#allocation4 + $0x170] sm:$0xf0]  ;;  %v3260_v53 = vor.u32 %v4101_v47, %v3257_v48  ;;  %v3997_v55 = vld [vmem:[#allocation4 + $0x44] sm:$0xf] }
  0x53   :  { %1173 = vmatpush.bf16.msrb.mxu2 %v3080_v59  ;;  %v2988_v54 = vor.u32 %v4033_v49, %v2985_v50  ;;  %v2841_v56 = vld [vmem:[#allocation4 + $0x50] sm:$0xf0]  ;;  %v4029_v57 = vld [vmem:[#allocation4 + $0x144] sm:$0xf]  ;;  %v3056_v50 = vor.u32 %v4052_v43, %v3055_v42 }
  0x54   :  { %1186 = vmatpush.bf16.msrb.mxu3 %v3208_v61  ;;  %v2969_v58 = vld [vmem:[#allocation4 + $0x150] sm:$0xf0]  ;;  %v2844_v59 = vor.u32 %v3997_v55, %v2841_v56  ;;  %v4065_v61 = vld [vmem:[#allocation4 + $0x264] sm:$0xf]  ;;  %v4048_v55 = vld [vmem:[#allocation4 + $0x1d4] sm:$0xf0] }
  0x55   :  { %1148 = vmatpush.bf16.msrb.mxu0 %v2808_v60  ;;  %v2972_v60 = vor.u32 %v4029_v57, %v2969_v58  ;;  %v3113_v62 = vld [vmem:[#allocation4 + $0x270] sm:$0xf0]  ;;  %v4097_v63 = vld [vmem:[#allocation4 + $0x364] sm:$0xf] }
  0x56   :  { %1161 = vmatpush.bf16.msrb.mxu1 %v2936_v2  ;;  %v3116_v0 = vor.u32 %v4065_v61, %v3113_v62  ;;  %v3241_v1 = vld [vmem:[#allocation4 + $0x370] sm:$0xf0]  ;;  %v4025_v6 = vld [vmem:[#allocation4 + $0x124] sm:$0xf]  ;;  %v3183_v61 = vld [vmem:[#allocation4 + $0x2e8] sm:$0xf] }
  0x57   :  { %1174 = vmatpush.bf16.msrb.mxu2 %v3064_v13  ;;  %v3244_v2 = vor.u32 %v4097_v63, %v3241_v1  ;;  %v2825_v4 = vld [vmem:[#allocation4 + $0x30] sm:$0xf0]  ;;  %v4061_v9 = vld [vmem:[#allocation4 + $0x244] sm:$0xf]  ;;  %v4084_v62 = vld [vmem:[#allocation4 + $0x2f4] sm:$0xf0] }
  0x58   :  { %1187 = vmatpush.bf16.msrb.mxu3 %v3192_v14  ;;  %v3097_v10 = vld [vmem:[#allocation4 + $0x250] sm:$0xf0]  ;;  %v4093_v11 = vld [vmem:[#allocation4 + $0x344] sm:$0xf]  ;;  %v3311_v63 = vld [vmem:[#allocation4 + $0x3e8] sm:$0xf] }
  0x59   :  { %1193 = vmatpush.bf16.msra.mxu0 %v2924_v3  ;;  %v3993_v3 = vld [vmem:[#allocation4 + $0x24] sm:$0xf]  ;;  %v3100_v12 = vor.u32 %v4061_v9, %v3097_v10  ;;  %v3225_v13 = vld [vmem:[#allocation4 + $0x350] sm:$0xf0]  ;;  %v3184_v10 = vor.u32 %v4084_v62, %v3183_v61  ;;  %v3996_v61 = vld [vmem:[#allocation4 + $0x34] sm:$0xf0] }
  0x5a   :  { %1206 = vmatpush.bf16.msra.mxu1 %v3052_v7  ;;  %v2828_v5 = vor.u32 %v3993_v3, %v2825_v4  ;;  %v2953_v7 = vld [vmem:[#allocation4 + $0x130] sm:$0xf0]  ;;  %v3228_v14 = vor.u32 %v4093_v11, %v3225_v13  ;;  %v4089_v24 = vld [vmem:[#allocation4 + $0x324] sm:$0xf]  ;;  %v4116_v3 = vld [vmem:[#allocation4 + $0x3f4] sm:$0xf0] }
  0x5b   :  { %1219 = vmatpush.bf16.msra.mxu2 %v3180_v15  ;;  %v2956_v8 = vor.u32 %v4025_v6, %v2953_v7  ;;  %v3989_v15 = vld [vmem:[#allocation4 + $0x4] sm:$0xf]  ;;  %v2937_v19 = vld [vmem:[#allocation4 + $0x110] sm:$0xf0]  ;;  %v2895_v4 = vld [vmem:[#allocation4 + $0xa8] sm:$0xf] }
  0x5c   :  { %1232 = vmatpush.bf16.msra.mxu3 %v3308_v17  ;;  %v4021_v17 = vld [vmem:[#allocation4 + $0x104] sm:$0xf]  ;;  %v3081_v22 = vld [vmem:[#allocation4 + $0x230] sm:$0xf0]  ;;  %v3023_v7 = vld [vmem:[#allocation4 + $0x1a8] sm:$0xf] }
  0x5d   :  { %1194 = vmatpush.bf16.msra.mxu0 %v2908_v16  ;;  %v2809_v16 = vld [vmem:[#allocation4 + $0x10] sm:$0xf0]  ;;  %v2940_v20 = vor.u32 %v4021_v17, %v2937_v19  ;;  %v4085_v30 = vld [vmem:[#allocation4 + $0x304] sm:$0xf]  ;;  %v4112_v19 = vld [vmem:[#allocation4 + $0x3d4] sm:$0xf0] }
  0x5e   :  { %1207 = vmatpush.bf16.msra.mxu1 %v3036_v21  ;;  %v2812_v18 = vor.u32 %v3989_v15, %v2809_v16  ;;  %v4057_v21 = vld [vmem:[#allocation4 + $0x224] sm:$0xf]  ;;  %v3209_v25 = vld [vmem:[#allocation4 + $0x330] sm:$0xf0]  ;;  %v4080_v15 = vld [vmem:[#allocation4 + $0x2d4] sm:$0xf0] }
  0x5f   :  { %1220 = vmatpush.bf16.msra.mxu2 %v3164_v27  ;;  %v3084_v23 = vor.u32 %v4057_v21, %v3081_v22  ;;  %v3212_v26 = vor.u32 %v4089_v24, %v3209_v25  ;;  %v4053_v27 = vld [vmem:[#allocation4 + $0x204] sm:$0xf]  ;;  %v3193_v31 = vld [vmem:[#allocation4 + $0x310] sm:$0xf0]  ;;  %v3295_v16 = vld [vmem:[#allocation4 + $0x3c8] sm:$0xf] }
  0x60   :  { %1233 = vmatpush.bf16.msra.mxu3 %v3292_v29  ;;  %v3196_v32 = vor.u32 %v4085_v30, %v3193_v31  ;;  %v4008_v21 = vld [vmem:[#allocation4 + $0x94] sm:$0xf0]  ;;  %v3007_v22 = vld [vmem:[#allocation4 + $0x188] sm:$0xf] }
  0x61   :  { %1195 = vmatpush.bf16.msra.mxu0 %v2892_v28  ;;  %v3065_v28 = vld [vmem:[#allocation4 + $0x210] sm:$0xf0]  ;;  %v4076_v30 = vld [vmem:[#allocation4 + $0x2b4] sm:$0xf0]  ;;  %v2959_v62 = vld [vmem:[#allocation4 + $0x128] sm:$0xf] }
  0x62   :  { %1208 = vmatpush.bf16.msra.mxu1 %v3020_v33  ;;  %v3068_v29 = vor.u32 %v4053_v27, %v3065_v28  ;;  %v132_v33 = vld [vmem:[#allocation9] ss:$8 sm:$0xf]  ;;  %v3296_v27 = vor.u32 %v4112_v19, %v3295_v16  ;;  %v4050_v16 = vld [vmem:[#allocation4 + $0x1ec] sm:$0xf] }
  0x63   :  { %1221 = vmatpush.bf16.msra.mxu2 %v3148_v39  ;;  %v134_v34 = vperm.slane %v132_v33, 0  ;;  %v135_v35 = vperm.slane %v132_v33, 1  ;;  %v2927_v39 = vld [vmem:[#allocation4 + $0xe8] sm:$0xf]  ;;  %v136_v46 = vperm.slane %v132_v33, 2  ;;  %v137_v49 = vperm.slane %v132_v33, 3 }
  0x64   :  { %1234 = vmatpush.bf16.msra.mxu3 %v3276_v41  ;;  %v4108_v33 = vld [vmem:[#allocation4 + $0x3b4] sm:$0xf0] }
  0x65   :  { %1196 = vmatpush.bf16.msra.mxu0 %v2876_v40  ;;  %v4020_v40 = vld [vmem:[#allocation4 + $0xf4] sm:$0xf0] }
  0x66   :  { %1209 = vmatpush.bf16.msra.mxu1 %v3004_v45  ;;  %v2928_v47 = vor.u32 %v4020_v40, %v2927_v39  ;;  %v3135_v40 = vld [vmem:[#allocation4 + $0x288] sm:$0xf] }
  0x67   :  { %1222 = vmatpush.bf16.msra.mxu2 %v3132_v51  ;;  %v2911_v51 = vld [vmem:[#allocation4 + $0xc8] sm:$0xf] }
  0x68   :  { %1235 = vmatpush.bf16.msra.mxu3 %v3260_v53 }
  0x69   :  { %1197 = vmatpush.bf16.msra.mxu0 %v2860_v52  ;;  %v4016_v52 = vld [vmem:[#allocation4 + $0xd4] sm:$0xf0] }
  0x6a   :  { %1210 = vmatpush.bf16.msra.mxu1 %v2988_v54  ;;  %v3039_v54 = vld [vmem:[#allocation4 + $0x1c8] sm:$0xf] }
  0x6b   :  { %1223 = vmatpush.bf16.msra.mxu2 %v3116_v0 }
  0x6c   :  { %1236 = vmatpush.bf16.msra.mxu3 %v3244_v2  ;;  %v3040_v2 = vor.u32 %v4048_v55, %v3039_v54  ;;  %v3119_v54 = vld [vmem:[#allocation4 + $0x268] sm:$0xf]  ;;  %v4068_v55 = vld [vmem:[#allocation4 + $0x274] sm:$0xf0] }
  0x6d   :  { %1198 = vmatpush.bf16.msra.mxu0 %v2844_v59 }
  0x6e   :  { %1211 = vmatpush.bf16.msra.mxu1 %v2972_v60  ;;  %v2912_v60 = vor.u32 %v4016_v52, %v2911_v51 }
  0x6f   :  { %1224 = vmatpush.bf16.msra.mxu2 %v3100_v12  ;;  %v3312_v12 = vor.u32 %v4116_v3, %v3311_v63  ;;  %v4028_v63 = vld [vmem:[#allocation4 + $0x134] sm:$0xf0] }
  0x70   :  { %1237 = vmatpush.bf16.msra.mxu3 %v3228_v14  ;;  %v3167_v14 = vld [vmem:[#allocation4 + $0x2c8] sm:$0xf]  ;;  %v4064_v3 = vld [vmem:[#allocation4 + $0x254] sm:$0xf0] }
  0x71   :  { %1199 = vmatpush.bf16.msra.mxu0 %v2828_v5  ;;  %v4012_v5 = vld [vmem:[#allocation4 + $0xb4] sm:$0xf0]  ;;  %v3168_v25 = vor.u32 %v4080_v15, %v3167_v14  ;;  %v2929_v15 = vld [vmem:[#allocation4 + $0xf8] sm:$0xf0] }
  0x72   :  { %1212 = vmatpush.bf16.msra.mxu1 %v2956_v8  ;;  %v4044_v8 = vld [vmem:[#allocation4 + $0x1b4] sm:$0xf0]  ;;  %v2896_v13 = vor.u32 %v4012_v5, %v2895_v4  ;;  %v3231_v4 = vld [vmem:[#allocation4 + $0x348] sm:$0xf] }
  0x73   :  { %1225 = vmatpush.bf16.msra.mxu2 %v3084_v23  ;;  %v4040_v23 = vld [vmem:[#allocation4 + $0x194] sm:$0xf0] }
  0x74   :  { %1238 = vmatpush.bf16.msra.mxu3 %v3212_v26  ;;  %v3008_v31 = vor.u32 %v4040_v23, %v3007_v22 }
  0x75   :  { %1200 = vmatpush.bf16.msra.mxu0 %v2812_v18  ;;  %v3024_v18 = vor.u32 %v4044_v8, %v3023_v7  ;;  %v4096_v7 = vld [vmem:[#allocation4 + $0x354] sm:$0xf0]  ;;  %v2815_v8 = vld [vmem:[#allocation4 + $0x8] sm:$0xf] }
  0x76   :  { %1213 = vmatpush.bf16.msra.mxu1 %v2940_v20  ;;  %v2879_v20 = vld [vmem:[#allocation4 + $0x88] sm:$0xf]  ;;  %v3232_v19 = vor.u32 %v4096_v7, %v3231_v4  ;;  %v3281_v7 = vld [vmem:[#allocation4 + $0x3b8] sm:$0xf0] }
  0x77   :  { %1226 = vmatpush.bf16.msra.mxu2 %v3068_v29  ;;  %v2880_v28 = vor.u32 %v4008_v21, %v2879_v20  ;;  %v3151_v29 = vld [vmem:[#allocation4 + $0x2a8] sm:$0xf]  ;;  %v4060_v21 = vld [vmem:[#allocation4 + $0x234] sm:$0xf0] }
  0x78   :  { %1239 = vmatpush.bf16.msra.mxu3 %v3196_v32  ;;  %v3279_v32 = vld [vmem:[#allocation4 + $0x3a8] sm:$0xf] }
  0x79   :  { %v3280_v39 = vor.u32 %v4108_v33, %v3279_v32  ;;  %v3087_v20 = vld [vmem:[#allocation4 + $0x228] sm:$0xf]  ;;  %v3041_v32 = vld [vmem:[#allocation4 + $0x1d8] sm:$0xf0] }
  0xb5   :  { %v311_v36 = vpop.f32.mrf.mxu0 }
  0xb6   :  { %v312_v37 = vadd.f32 %v311_v36, %v134_v34  ;;  %v324_v38 = vpop.f32.mrf.mxu1  ;;  %v2863_v34 = vld [vmem:[#allocation4 + $0x68] sm:$0xf] }
  0xb7   :  { %v325_v41 = vadd.f32 %v324_v38, %v135_v35  ;;  %v4004_v35 = vld [vmem:[#allocation4 + $0x74] sm:$0xf0]  ;;  %v2991_v36 = vld [vmem:[#allocation4 + $0x168] sm:$0xf]  ;;  %v3152_v38 = vor.u32 %v4076_v30, %v3151_v29  ;;  %v3088_v29 = vor.u32 %v4060_v21, %v3087_v20  ;;  %v2913_v30 = vld [vmem:[#allocation4 + $0xd8] sm:$0xf0] }
  0xb8   :  { %v354_v44 = vmax.f32 %v312_v37, 0.0  ;;  %v4036_v37 = vld [vmem:[#allocation4 + $0x174] sm:$0xf0]  ;;  %v2864_v42 = vor.u32 %v4004_v35, %v2863_v34  ;;  %v3071_v34 = vld [vmem:[#allocation4 + $0x208] sm:$0xf] }
  0xb9   :  { %v355_v45 = vmax.f32 %v325_v41, 0.0  ;;  %v4072_v41 = vld [vmem:[#allocation4 + $0x294] sm:$0xf0]  ;;  %v2992_v43 = vor.u32 %v4036_v37, %v2991_v36  ;;  %v3199_v36 = vld [vmem:[#allocation4 + $0x308] sm:$0xf] }
  0xba   :  { %v4474_v48 = vpack.c.bf16 %v354_v44, %v354_v44  ;;  %v3263_v44 = vld [vmem:[#allocation4 + $0x388] sm:$0xf]  ;;  %v3136_v51 = vor.u32 %v4072_v41, %v3135_v40  ;;  %v4056_v35 = vld [vmem:[#allocation4 + $0x214] sm:$0xf0]  ;;  %v4102_v20 = vld [vmem:[#allocation4 + $0x38c] sm:$0xf] }
  0xbb   :  { %v4476_v53 = vpack.c.bf16 %v355_v45, %v355_v45  ;;  %v4104_v45 = vld [vmem:[#allocation4 + $0x394] sm:$0xf0]  ;;  %v3265_v21 = vld [vmem:[#allocation4 + $0x398] sm:$0xf0] }
  0xbc   :  { %1149 = vmatmul.bf16.vlgmr.msrb.gmra.mxu0 %v4474_v48  ;;  %v3264_v52 = vor.u32 %v4104_v45, %v3263_v44  ;;  %v4088_v37 = vld [vmem:[#allocation4 + $0x314] sm:$0xf0]  ;;  %v4010_v44 = vld [vmem:[#allocation4 + $0xac] sm:$0xf]  ;;  %v3072_v45 = vor.u32 %v4056_v35, %v3071_v34  ;;  %v2833_v35 = vld [vmem:[#allocation4 + $0x38] sm:$0xf0] }
  0xbd   :  { %v337_v56 = vpop.f32.mrf.mxu2  ;;  %1162 = vmatmul.bf16.vlgmr.msrb.gmra.mxu1 %v4476_v53  ;;  %1245 = vmatpush.bf16.msrb.mxu0 %v2928_v47  ;;  %v313_v59 = vpop.f32.mrf.mxu0  ;;  %v4000_v47 = vld [vmem:[#allocation4 + $0x54] sm:$0xf0]  ;;  %v3994_v34 = vld [vmem:[#allocation4 + $0x2c] sm:$0xf] }
  0xbe   :  { %v338_v57 = vadd.f32 %v337_v56, %v136_v46  ;;  %v350_v58 = vpop.f32.mrf.mxu3  ;;  %1258 = vmatpush.bf16.msrb.mxu1 %v3056_v50  ;;  %v326_v1 = vpop.f32.mrf.mxu1  ;;  %v2847_v46 = vld [vmem:[#allocation4 + $0x48] sm:$0xf]  ;;  %v4032_v50 = vld [vmem:[#allocation4 + $0x154] sm:$0xf0] }
  0xbf   :  { %v351_v0 = vadd.f32 %v350_v58, %v137_v49  ;;  %v2975_v49 = vld [vmem:[#allocation4 + $0x148] sm:$0xf]  ;;  %v2848_v56 = vor.u32 %v4000_v47, %v2847_v46  ;;  %v4100_v59 = vld [vmem:[#allocation4 + $0x374] sm:$0xf0]  ;;  %v2897_v46 = vld [vmem:[#allocation4 + $0xb8] sm:$0xf0] }
  0xc0   :  { %v356_v6 = vmax.f32 %v338_v57, 0.0  ;;  %v2976_v57 = vor.u32 %v4032_v50, %v2975_v49  ;;  %v3247_v58 = vld [vmem:[#allocation4 + $0x368] sm:$0xf]  ;;  %v4042_v47 = vld [vmem:[#allocation4 + $0x1ac] sm:$0xf]  ;;  %v3200_v50 = vor.u32 %v4088_v37, %v3199_v36 }
  0xc1   :  { %v357_v9 = vmax.f32 %v351_v0, 0.0  ;;  %1246 = vmatpush.bf16.msrb.mxu0 %v2912_v60  ;;  %v2831_v60 = vld [vmem:[#allocation4 + $0x28] sm:$0xf]  ;;  %v3120_v0 = vor.u32 %v4068_v55, %v3119_v54  ;;  %v3248_v1 = vor.u32 %v4100_v59, %v3247_v58  ;;  %v3025_v49 = vld [vmem:[#allocation4 + $0x1b8] sm:$0xf0] }
  0xc2   :  { %v4480_v11 = vpack.c.bf16 %v356_v6, %v356_v6  ;;  %1259 = vmatpush.bf16.msrb.mxu1 %v3040_v2  ;;  %v3103_v2 = vld [vmem:[#allocation4 + $0x248] sm:$0xf]  ;;  %v2832_v5 = vor.u32 %v3996_v61, %v2831_v60  ;;  %v2960_v6 = vor.u32 %v4028_v63, %v2959_v62  ;;  %v4078_v54 = vld [vmem:[#allocation4 + $0x2cc] sm:$0xf]  ;;  %v3169_v55 = vld [vmem:[#allocation4 + $0x2d8] sm:$0xf0] }
  0xc3   :  { %v4482_v17 = vpack.c.bf16 %v357_v9, %v357_v9  ;;  %v3992_v9 = vld [vmem:[#allocation4 + $0x14] sm:$0xf0]  ;;  %v3104_v14 = vor.u32 %v4064_v3, %v3103_v2  ;;  %v4110_v58 = vld [vmem:[#allocation4 + $0x3cc] sm:$0xf]  ;;  %v3297_v59 = vld [vmem:[#allocation4 + $0x3d8] sm:$0xf0] }
  0xc4   :  { %1175 = vmatmul.bf16.vlgmr.msrb.gmra.mxu2 %v4480_v11  ;;  %v2816_v22 = vor.u32 %v3992_v9, %v2815_v8  ;;  %v4006_v60 = vld [vmem:[#allocation4 + $0x8c] sm:$0xf]  ;;  %v2881_v61 = vld [vmem:[#allocation4 + $0x98] sm:$0xf0] }
  0xc5   :  { %1188 = vmatmul.bf16.vlgmr.msrb.gmra.mxu3 %v4482_v17  ;;  %1271 = vmatpush.bf16.msrb.mxu2 %v3184_v10  ;;  %v339_v24 = vpop.f32.mrf.mxu2  ;;  %v2943_v10 = vld [vmem:[#allocation4 + $0x108] sm:$0xf]  ;;  %v4038_v62 = vld [vmem:[#allocation4 + $0x18c] sm:$0xf]  ;;  %v3009_v63 = vld [vmem:[#allocation4 + $0x198] sm:$0xf0]  ;;  %v2884_v4 = vor.u32 %v4006_v60, %v2881_v61 }
  0xc6   :  { %1284 = vmatpush.bf16.msrb.mxu3 %v3312_v12  ;;  %v352_v26 = vpop.f32.mrf.mxu3  ;;  %1247 = vmatpush.bf16.msrb.mxu0 %v2896_v13  ;;  %v4024_v12 = vld [vmem:[#allocation4 + $0x114] sm:$0xf0]  ;;  %v4018_v13 = vld [vmem:[#allocation4 + $0xec] sm:$0xf]  ;;  %v3215_v24 = vld [vmem:[#allocation4 + $0x328] sm:$0xf] }
  0xc7   :  { %1260 = vmatpush.bf16.msrb.mxu1 %v3024_v18  ;;  %v3057_v18 = vld [vmem:[#allocation4 + $0x1f8] sm:$0xf0]  ;;  %v2944_v23 = vor.u32 %v4024_v12, %v2943_v10  ;;  %v2932_v26 = vor.u32 %v4018_v13, %v2929_v15  ;;  %v4074_v2 = vld [vmem:[#allocation4 + $0x2ac] sm:$0xf] }
  0xc8   :  { %v3153_v3 = vld [vmem:[#allocation4 + $0x2b8] sm:$0xf0]  ;;  %v4002_v8 = vld [vmem:[#allocation4 + $0x6c] sm:$0xf] }
  0xc9   :  { %1272 = vmatpush.bf16.msrb.mxu2 %v3168_v25  ;;  %v4092_v25 = vld [vmem:[#allocation4 + $0x334] sm:$0xf0]  ;;  %v2865_v9 = vld [vmem:[#allocation4 + $0x78] sm:$0xf0]  ;;  %v4034_v10 = vld [vmem:[#allocation4 + $0x16c] sm:$0xf]  ;;  %v3156_v13 = vor.u32 %v4074_v2, %v3153_v3 }
  0xca   :  { %1285 = vmatpush.bf16.msrb.mxu3 %v3296_v27  ;;  %1248 = vmatpush.bf16.msrb.mxu0 %v2880_v28  ;;  %v3060_v27 = vor.u32 %v4050_v16, %v3057_v18  ;;  %v4014_v28 = vld [vmem:[#allocation4 + $0xcc] sm:$0xf]  ;;  %v3216_v33 = vor.u32 %v4092_v25, %v3215_v24  ;;  %v2993_v12 = vld [vmem:[#allocation4 + $0x178] sm:$0xf0]  ;;  %v2868_v18 = vor.u32 %v4002_v8, %v2865_v9 }
  0xcb   :  { %1261 = vmatpush.bf16.msrb.mxu1 %v3008_v31  ;;  %v4046_v31 = vld [vmem:[#allocation4 + $0x1cc] sm:$0xf]  ;;  %v2916_v40 = vor.u32 %v4014_v28, %v2913_v30  ;;  %v3137_v16 = vld [vmem:[#allocation4 + $0x298] sm:$0xf0] }
  0xcc   :  { %1201 = vmatmul.bf16.vlgmr.msra.gmra.mxu0 %v4474_v48  ;;  %v3044_v41 = vor.u32 %v4046_v31, %v3041_v32  ;;  %v4070_v15 = vld [vmem:[#allocation4 + $0x28c] sm:$0xf]  ;;  %v2977_v25 = vld [vmem:[#allocation4 + $0x158] sm:$0xf0] }
  0xcd   :  { %1273 = vmatpush.bf16.msrb.mxu2 %v3152_v38  ;;  %1214 = vmatmul.bf16.vlgmr.msra.gmra.mxu1 %v4476_v53  ;;  %v4082_v38 = vld [vmem:[#allocation4 + $0x2ec] sm:$0xf]  ;;  %v2961_v37 = vld [vmem:[#allocation4 + $0x138] sm:$0xf0] }
  0xce   :  { %1286 = vmatpush.bf16.msrb.mxu3 %v3280_v39  ;;  %1249 = vmatpush.bf16.msrb.mxu0 %v2864_v42  ;;  %v3185_v39 = vld [vmem:[#allocation4 + $0x2f8] sm:$0xf0]  ;;  %v4114_v42 = vld [vmem:[#allocation4 + $0x3ec] sm:$0xf] }
  0xcf   :  { %1262 = vmatpush.bf16.msrb.mxu1 %v2992_v43  ;;  %v3313_v43 = vld [vmem:[#allocation4 + $0x3f8] sm:$0xf0]  ;;  %v4030_v24 = vld [vmem:[#allocation4 + $0x14c] sm:$0xf] }
  0xd0   :  { %v4066_v28 = vld [vmem:[#allocation4 + $0x26c] sm:$0xf]  ;;  %v2980_v31 = vor.u32 %v4030_v24, %v2977_v25  ;;  %v3073_v9 = vld [vmem:[#allocation4 + $0x218] sm:$0xf0]  ;;  %v3671_v25 = vld [vmem:[#allocation6 + $0x2c0] sm:$0xf] }
  0xd1   :  { %1274 = vmatpush.bf16.msrb.mxu2 %v3136_v51  ;;  %v3188_v51 = vor.u32 %v4082_v38, %v3185_v39  ;;  %v4098_v32 = vld [vmem:[#allocation4 + $0x36c] sm:$0xf] }
  0xd2   :  { %1287 = vmatpush.bf16.msrb.mxu3 %v3264_v52  ;;  %1250 = vmatpush.bf16.msrb.mxu0 %v2848_v56  ;;  %v3316_v52 = vor.u32 %v4114_v42, %v3313_v43  ;;  %v2900_v56 = vor.u32 %v4010_v44, %v2897_v46  ;;  %v4026_v36 = vld [vmem:[#allocation4 + $0x12c] sm:$0xf]  ;;  %v2836_v43 = vor.u32 %v3994_v34, %v2833_v35  ;;  %v4131_v34 = vld [vmem:[#allocation6 + $0x6c] sm:$0xf0] }
  0xd3   :  { %1263 = vmatpush.bf16.msrb.mxu1 %v2976_v57  ;;  %v3028_v57 = vor.u32 %v4042_v47, %v3025_v49  ;;  %v4094_v42 = vld [vmem:[#allocation4 + $0x34c] sm:$0xf]  ;;  %v2964_v44 = vor.u32 %v4026_v36, %v2961_v37  ;;  %v2817_v47 = vld [vmem:[#allocation4 + $0x18] sm:$0xf0]  ;;  %v3495_v36 = vld [vmem:[#allocation6 + $0x160] sm:$0xf] }
  0xd4   :  { %1227 = vmatmul.bf16.vlgmr.msra.gmra.mxu2 %v4480_v11  ;;  %v3990_v46 = vld [vmem:[#allocation4 + $0xc] sm:$0xf]  ;;  %v4163_v37 = vld [vmem:[#allocation6 + $0x16c] sm:$0xf0] }
  0xd5   :  { %1240 = vmatmul.bf16.vlgmr.msra.gmra.mxu3 %v4482_v17  ;;  %1275 = vmatpush.bf16.msrb.mxu2 %v3120_v0  ;;  %v3172_v0 = vor.u32 %v4078_v54, %v3169_v55  ;;  %v4022_v49 = vld [vmem:[#allocation4 + $0x10c] sm:$0xf]  ;;  %v4147_v54 = vld [vmem:[#allocation6 + $0xec] sm:$0xf0]  ;;  %v3559_v55 = vld [vmem:[#allocation6 + $0x1e0] sm:$0xf]  ;;  %v2820_v60 = vor.u32 %v3990_v46, %v2817_v47 }
  0xd6   :  { %1288 = vmatpush.bf16.msrb.mxu3 %v3248_v1  ;;  %1251 = vmatpush.bf16.msrb.mxu0 %v2832_v5  ;;  %v3300_v1 = vor.u32 %v4110_v58, %v3297_v59  ;;  %v3012_v5 = vor.u32 %v4038_v62, %v3009_v63  ;;  %v4058_v58 = vld [vmem:[#allocation4 + $0x22c] sm:$0xf]  ;;  %v3089_v59 = vld [vmem:[#allocation4 + $0x238] sm:$0xf0]  ;;  %v3319_v47 = vld [vmem:[#allocation6] sm:$0xf] }
  0xd7   :  { %1264 = vmatpush.bf16.msrb.mxu1 %v2960_v6  ;;  %v4106_v6 = vld [vmem:[#allocation4 + $0x3ac] sm:$0xf]  ;;  %v3217_v63 = vld [vmem:[#allocation4 + $0x338] sm:$0xf0]  ;;  %v3092_v3 = vor.u32 %v4058_v58, %v3089_v59  ;;  %v4137_v58 = vld [vmem:[#allocation6 + $0xa4] sm:$0xf] }
  0xd8   :  { %v4090_v62 = vld [vmem:[#allocation4 + $0x32c] sm:$0xf]  ;;  %v3401_v59 = vld [vmem:[#allocation6 + $0xb0] sm:$0xf0] }
  0xd9   :  { %1276 = vmatpush.bf16.msrb.mxu2 %v3104_v14  ;;  %v3284_v14 = vor.u32 %v4106_v6, %v3281_v7  ;;  %v4175_v6 = vld [vmem:[#allocation6 + $0x1cc] sm:$0xf0]  ;;  %v3220_v7 = vor.u32 %v4090_v62, %v3217_v63  ;;  %v4054_v8 = vld [vmem:[#allocation4 + $0x20c] sm:$0xf]  ;;  %v3655_v63 = vld [vmem:[#allocation6 + $0x2a0] sm:$0xf] }
  0xda   :  { %1289 = vmatpush.bf16.msrb.mxu3 %v3232_v19  ;;  %1252 = vmatpush.bf16.msrb.mxu0 %v2816_v22  ;;  %v2996_v19 = vor.u32 %v4034_v10, %v2993_v12  ;;  %v3998_v22 = vld [vmem:[#allocation4 + $0x4c] sm:$0xf]  ;;  %v3201_v12 = vld [vmem:[#allocation4 + $0x318] sm:$0xf0]  ;;  %v4155_v62 = vld [vmem:[#allocation6 + $0x12c] sm:$0xf0] }
  0xdb   :  { %1265 = vmatpush.bf16.msrb.mxu1 %v2944_v23  ;;  %v2849_v23 = vld [vmem:[#allocation4 + $0x58] sm:$0xf0]  ;;  %v4086_v10 = vld [vmem:[#allocation4 + $0x30c] sm:$0xf] }
  0xdc   :  { %v2852_v30 = vor.u32 %v3998_v22, %v2849_v23  ;;  %v3527_v22 = vld [vmem:[#allocation6 + $0x1a0] sm:$0xf]  ;;  %v4171_v23 = vld [vmem:[#allocation6 + $0x1ac] sm:$0xf0] }
  0xdd   :  { %1277 = vmatpush.bf16.msrb.mxu2 %v3088_v29  ;;  %1253 = vmatmul.bf16.vlgmr.msrb.gmra.mxu0 %v4474_v48  ;;  %v3121_v29 = vld [vmem:[#allocation4 + $0x278] sm:$0xf0] }
  0xde   :  { %1297 = vmatpush.bf16.msra.mxu0 %v2932_v26  ;;  %1290 = vmatpush.bf16.msrb.mxu3 %v3216_v33  ;;  %v3140_v26 = vor.u32 %v4070_v15, %v3137_v16  ;;  %v3249_v33 = vld [vmem:[#allocation4 + $0x378] sm:$0xf0]  ;;  %v3124_v38 = vor.u32 %v4066_v28, %v3121_v29  ;;  %v3383_v28 = vld [vmem:[#allocation6 + $0x80] sm:$0xf]  ;;  %v4135_v29 = vld [vmem:[#allocation6 + $0x8c] sm:$0xf0] }
  0xdf   :  { %1310 = vmatpush.bf16.msra.mxu1 %v3060_v27  ;;  %v3268_v27 = vor.u32 %v4102_v20, %v3265_v21  ;;  %v3252_v39 = vor.u32 %v4098_v32, %v3249_v33  ;;  %v4139_v20 = vld [vmem:[#allocation6 + $0xac] sm:$0xf0]  ;;  %v3204_v21 = vor.u32 %v4086_v10, %v3201_v12  ;;  %v3384_v33 = vor.u32 %v4135_v29, %v3383_v28  ;;  %v3607_v29 = vld [vmem:[#allocation6 + $0x240] sm:$0xf] }
  0xe0   :  { %1266 = vmatmul.bf16.vlgmr.msrb.gmra.mxu1 %v4476_v53  ;;  %v4167_v32 = vld [vmem:[#allocation6 + $0x18c] sm:$0xf0] }
  0xe1   :  { %1278 = vmatpush.bf16.msrb.mxu2 %v3072_v45  ;;  %v3233_v45 = vld [vmem:[#allocation4 + $0x358] sm:$0xf0]  ;;  %v4199_v10 = vld [vmem:[#allocation6 + $0x28c] sm:$0xf0] }
  0xe2   :  { %1298 = vmatpush.bf16.msra.mxu0 %v2916_v40  ;;  %1291 = vmatpush.bf16.msrb.mxu3 %v3200_v50  ;;  %v4062_v40 = vld [vmem:[#allocation4 + $0x24c] sm:$0xf]  ;;  %v2945_v50 = vld [vmem:[#allocation4 + $0x118] sm:$0xf0] }
  0xe3   :  { %1311 = vmatpush.bf16.msra.mxu1 %v3044_v41  ;;  %v3105_v41 = vld [vmem:[#allocation4 + $0x258] sm:$0xf0]  ;;  %v2948_v61 = vor.u32 %v4022_v49, %v2945_v50  ;;  %v4119_v49 = vld [vmem:[#allocation6 + $0xc] sm:$0xf0]  ;;  %v4145_v50 = vld [vmem:[#allocation6 + $0xe4] sm:$0xf] }
  0xe4   :  { %1279 = vmatmul.bf16.vlgmr.msrb.gmra.mxu2 %v4480_v11 }
  0xe5   :  { %1323 = vmatpush.bf16.msra.mxu2 %v3188_v51  ;;  %1292 = vmatmul.bf16.vlgmr.msrb.gmra.mxu3 %v4482_v17  ;;  %v3431_v51 = vld [vmem:[#allocation6 + $0xe0] sm:$0xf] }
  0xe6   :  { %1336 = vmatpush.bf16.msra.mxu3 %v3316_v52  ;;  %1299 = vmatpush.bf16.msra.mxu0 %v2900_v56  ;;  %v3108_v52 = vor.u32 %v4062_v40, %v3105_v41  ;;  %v4179_v56 = vld [vmem:[#allocation6 + $0x1ec] sm:$0xf0]  ;;  %v3496_v41 = vor.u32 %v4163_v37, %v3495_v36  ;;  %v3591_v36 = vld [vmem:[#allocation6 + $0x220] sm:$0xf] }
  0xe7   :  { %1312 = vmatpush.bf16.msra.mxu1 %v3028_v57  ;;  %v3236_v57 = vor.u32 %v4094_v42, %v3233_v45  ;;  %v3560_v2 = vor.u32 %v4179_v56, %v3559_v55  ;;  %v4127_v40 = vld [vmem:[#allocation6 + $0x4c] sm:$0xf0]  ;;  %v3479_v42 = vld [vmem:[#allocation6 + $0x140] sm:$0xf]  ;;  %v4141_v55 = vld [vmem:[#allocation6 + $0xc4] sm:$0xf] }
  0xe8   :  { %v4123_v45 = vld [vmem:[#allocation6 + $0x2c] sm:$0xf0]  ;;  %v3417_v56 = vld [vmem:[#allocation6 + $0xd0] sm:$0xf0] }
  0xe9   :  { %1324 = vmatpush.bf16.msra.mxu2 %v3172_v0  ;;  %v3432_v0 = vor.u32 %v4147_v54, %v3431_v51  ;;  %v3433_v51 = vld [vmem:[#allocation6 + $0xf0] sm:$0xf0]  ;;  %v4187_v37 = vld [vmem:[#allocation6 + $0x22c] sm:$0xf0] }
  0xea   :  { %1337 = vmatpush.bf16.msra.mxu3 %v3300_v1  ;;  %1300 = vmatpush.bf16.msra.mxu0 %v2884_v4  ;;  %v3415_v1 = vld [vmem:[#allocation6 + $0xc0] sm:$0xf]  ;;  %v4143_v4 = vld [vmem:[#allocation6 + $0xcc] sm:$0xf0]  ;;  %v3436_v54 = vor.u32 %v4145_v50, %v3433_v51  ;;  %v3497_v50 = vld [vmem:[#allocation6 + $0x170] sm:$0xf0] }
  0xeb   :  { %1313 = vmatpush.bf16.msra.mxu1 %v3012_v5  ;;  %v3543_v5 = vld [vmem:[#allocation6 + $0x1c0] sm:$0xf]  ;;  %v3416_v15 = vor.u32 %v4143_v4, %v3415_v1  ;;  %v4203_v1 = vld [vmem:[#allocation6 + $0x2ac] sm:$0xf0] }
  0xec   :  { %v3544_v16 = vor.u32 %v4175_v6, %v3543_v5  ;;  %v3656_v4 = vor.u32 %v4203_v1, %v3655_v63  ;;  %v3447_v6 = vld [vmem:[#allocation6 + $0x100] sm:$0xf] }
  0xed   :  { %1325 = vmatpush.bf16.msra.mxu2 %v3156_v13  ;;  %v3687_v13 = vld [vmem:[#allocation6 + $0x2e0] sm:$0xf] }
  0xee   :  { %1338 = vmatpush.bf16.msra.mxu3 %v3284_v14  ;;  %1301 = vmatpush.bf16.msra.mxu0 %v2868_v18  ;;  %v4211_v14 = vld [vmem:[#allocation6 + $0x2ec] sm:$0xf0]  ;;  %v3076_v18 = vor.u32 %v4054_v8, %v3073_v9  ;;  %v3639_v8 = vld [vmem:[#allocation6 + $0x280] sm:$0xf] }
  0xef   :  { %1314 = vmatpush.bf16.msra.mxu1 %v2996_v19  ;;  %v3399_v19 = vld [vmem:[#allocation6 + $0xa0] sm:$0xf]  ;;  %v3688_v24 = vor.u32 %v4211_v14, %v3687_v13  ;;  %v3640_v12 = vor.u32 %v4199_v10, %v3639_v8  ;;  %v4129_v13 = vld [vmem:[#allocation6 + $0x64] sm:$0xf]  ;;  %v3369_v14 = vld [vmem:[#allocation6 + $0x70] sm:$0xf0] }
  0xf0   :  { %v4498_v1 = vld [vmem:[#allocation9 + $0x1] ss:$8 sm:$0xf]  ;;  %v3465_v8 = vld [vmem:[#allocation6 + $0x130] sm:$0xf0] }
  0xf1   :  { %1326 = vmatpush.bf16.msra.mxu2 %v3140_v26  ;;  %v4207_v26 = vld [vmem:[#allocation6 + $0x2cc] sm:$0xf0] }
  0xf2   :  { %1339 = vmatpush.bf16.msra.mxu3 %v3268_v27  ;;  %1302 = vmatpush.bf16.msra.mxu0 %v2852_v30  ;;  %v3400_v27 = vor.u32 %v4139_v20, %v3399_v19  ;;  %v3528_v30 = vor.u32 %v4171_v23, %v3527_v22  ;;  %v3623_v19 = vld [vmem:[#allocation6 + $0x260] sm:$0xf]  ;;  %v4195_v20 = vld [vmem:[#allocation6 + $0x26c] sm:$0xf0]  ;;  %v4125_v23 = vld [vmem:[#allocation6 + $0x44] sm:$0xf] }
  0xf3   :  { %1315 = vmatpush.bf16.msra.mxu1 %v2980_v31  ;;  %v3511_v31 = vld [vmem:[#allocation6 + $0x180] sm:$0xf]  ;;  %v3624_v22 = vor.u32 %v4195_v20, %v3623_v19  ;;  %v4149_v20 = vld [vmem:[#allocation6 + $0x104] sm:$0xf] }
  0xf4   :  { %v3512_v35 = vor.u32 %v4167_v32, %v3511_v31  ;;  %v4121_v32 = vld [vmem:[#allocation6 + $0x24] sm:$0xf] }
  0xf5   :  { %1327 = vmatpush.bf16.msra.mxu2 %v3124_v38 }
  0xf6   :  { %1340 = vmatpush.bf16.msra.mxu3 %v3252_v39  ;;  %1303 = vmatpush.bf16.msra.mxu0 %v2836_v43  ;;  %v3351_v39 = vld [vmem:[#allocation6 + $0x40] sm:$0xf]  ;;  %v4159_v43 = vld [vmem:[#allocation6 + $0x14c] sm:$0xf0] }
  0xf7   :  { %1316 = vmatpush.bf16.msra.mxu1 %v2964_v44  ;;  %v3335_v44 = vld [vmem:[#allocation6 + $0x20] sm:$0xf] }
  0xf8   :  { %v3336_v46 = vor.u32 %v4123_v45, %v3335_v44  ;;  %v3575_v44 = vld [vmem:[#allocation6 + $0x200] sm:$0xf]  ;;  %v4183_v45 = vld [vmem:[#allocation6 + $0x20c] sm:$0xf0] }
  0xf9   :  { %1328 = vmatpush.bf16.msra.mxu2 %v3108_v52  ;;  %v3320_v52 = vor.u32 %v4119_v49, %v3319_v47  ;;  %v4243_v47 = vld [vmem:[#allocation6 + $0x3ec] sm:$0xf0]  ;;  %v4161_v49 = vld [vmem:[#allocation6 + $0x164] sm:$0xf] }
  0xfa   :  { %1341 = vmatpush.bf16.msra.mxu3 %v3236_v57  ;;  %1304 = vmatpush.bf16.msra.mxu0 %v2820_v60  ;;  %v3420_v57 = vor.u32 %v4141_v55, %v3417_v56  ;;  %v3404_v60 = vor.u32 %v4137_v58, %v3401_v59  ;;  %v3689_v55 = vld [vmem:[#allocation6 + $0x2f0] sm:$0xf0]  ;;  %v4239_v58 = vld [vmem:[#allocation6 + $0x3cc] sm:$0xf0] }
  0xfb   :  { %1317 = vmatpush.bf16.msra.mxu1 %v2948_v61  ;;  %v3463_v61 = vld [vmem:[#allocation6 + $0x120] sm:$0xf] }
  0xfd   :  { %1329 = vmatpush.bf16.msra.mxu2 %v3092_v3  ;;  %1305 = vmatmul.bf16.vlgmr.msra.gmra.mxu0 %v4474_v48  ;;  %v3672_v48 = vor.u32 %v4207_v26, %v3671_v25  ;;  %v3385_v3 = vld [vmem:[#allocation6 + $0x90] sm:$0xf0]  ;;  %v4173_v25 = vld [vmem:[#allocation6 + $0x1c4] sm:$0xf] }
  0xfe   :  { %2136 = vmatpush.bf16.msrb.mxu0 %v3432_v0  ;;  %1342 = vmatpush.bf16.msra.mxu3 %v3220_v7  ;;  %v3464_v0 = vor.u32 %v4155_v62, %v3463_v61  ;;  %v4151_v7 = vld [vmem:[#allocation6 + $0x10c] sm:$0xf0]  ;;  %v3481_v61 = vld [vmem:[#allocation6 + $0x150] sm:$0xf0]  ;;  %v4205_v62 = vld [vmem:[#allocation6 + $0x2c4] sm:$0xf] }
  0xff   :  { %2149 = vmatpush.bf16.msrb.mxu1 %v3560_v2  ;;  %v4133_v2 = vld [vmem:[#allocation6 + $0x84] sm:$0xf]  ;;  %v3448_v9 = vor.u32 %v4151_v7, %v3447_v6 }
 0x100   :  { %1318 = vmatmul.bf16.vlgmr.msra.gmra.mxu1 %v4476_v53  ;;  %v3367_v53 = vld [vmem:[#allocation6 + $0x60] sm:$0xf]  ;;  %v3388_v5 = vor.u32 %v4133_v2, %v3385_v3  ;;  %v4153_v7 = vld [vmem:[#allocation6 + $0x124] sm:$0xf] }
 0x101   :  { %1330 = vmatpush.bf16.msra.mxu2 %v3076_v18  ;;  %v3368_v38 = vor.u32 %v4131_v34, %v3367_v53  ;;  %v3561_v18 = vld [vmem:[#allocation6 + $0x1f0] sm:$0xf0]  ;;  %v3783_v3 = vld [vmem:[#allocation6 + $0x3a0] sm:$0xf] }
 0x102   :  { %2137 = vmatpush.bf16.msrb.mxu0 %v3416_v15  ;;  %1343 = vmatpush.bf16.msra.mxu3 %v3204_v21  ;;  %v4177_v15 = vld [vmem:[#allocation6 + $0x1e4] sm:$0xf]  ;;  %v3529_v34 = vld [vmem:[#allocation6 + $0x1b0] sm:$0xf0] }
 0x103   :  { %2150 = vmatpush.bf16.msrb.mxu1 %v3544_v16  ;;  %v3372_v16 = vor.u32 %v4129_v13, %v3369_v14  ;;  %v3564_v21 = vor.u32 %v4177_v15, %v3561_v18  ;;  %v3657_v13 = vld [vmem:[#allocation6 + $0x2b0] sm:$0xf0]  ;;  %v493_v14 = vperm.slane %v4498_v1, 0  ;;  %v4231_v18 = vld [vmem:[#allocation6 + $0x38c] sm:$0xf0] }
 0x104   :  { %1331 = vmatmul.bf16.vlgmr.msra.gmra.mxu2 %v4480_v11  ;;  %v3352_v11 = vor.u32 %v4127_v40, %v3351_v39  ;;  %v4117_v39 = vld [vmem:[#allocation6 + $0x4] sm:$0xf]  ;;  %v3321_v40 = vld [vmem:[#allocation6 + $0x10] sm:$0xf0] }
 0x105   :  { %2162 = vmatpush.bf16.msrb.mxu2 %v3688_v24  ;;  %1344 = vmatmul.bf16.vlgmr.msra.gmra.mxu3 %v4482_v17  ;;  %v3480_v17 = vor.u32 %v4159_v43, %v3479_v42  ;;  %v3353_v24 = vld [vmem:[#allocation6 + $0x50] sm:$0xf0]  ;;  %v3324_v42 = vor.u32 %v4117_v39, %v3321_v40 }
 0x106   :  { %2138 = vmatpush.bf16.msrb.mxu0 %v3400_v27  ;;  %v3356_v26 = vor.u32 %v4125_v23, %v3353_v24  ;;  %v3545_v27 = vld [vmem:[#allocation6 + $0x1d0] sm:$0xf0] }
 0x107   :  { %2151 = vmatpush.bf16.msrb.mxu1 %v3528_v30  ;;  %v3548_v28 = vor.u32 %v4173_v25, %v3545_v27  ;;  %v4191_v30 = vld [vmem:[#allocation6 + $0x24c] sm:$0xf0]  ;;  %v3513_v43 = vld [vmem:[#allocation6 + $0x190] sm:$0xf0]  ;;  %v3751_v27 = vld [vmem:[#allocation6 + $0x360] sm:$0xf] }
 0x108   :  { %v3608_v31 = vor.u32 %v4191_v30, %v3607_v29  ;;  %v3641_v24 = vld [vmem:[#allocation6 + $0x290] sm:$0xf0] }
 0x109   :  { %2163 = vmatpush.bf16.msrb.mxu2 %v3672_v48  ;;  %v3337_v48 = vld [vmem:[#allocation6 + $0x30] sm:$0xf0] }
 0x10a   :  { %2139 = vmatpush.bf16.msrb.mxu0 %v3384_v33  ;;  %v4169_v33 = vld [vmem:[#allocation6 + $0x1a4] sm:$0xf]  ;;  %v3340_v53 = vor.u32 %v4121_v32, %v3337_v48  ;;  %v3625_v32 = vld [vmem:[#allocation6 + $0x270] sm:$0xf0] }
 0x10b   :  { %2152 = vmatpush.bf16.msrb.mxu1 %v3512_v35  ;;  %v3532_v35 = vor.u32 %v4169_v33, %v3529_v34  ;;  %v3735_v34 = vld [vmem:[#allocation6 + $0x340] sm:$0xf] }
 0x10d   :  { %2164 = vmatpush.bf16.msrb.mxu2 %v3656_v4  ;;  %v4235_v4 = vld [vmem:[#allocation6 + $0x3ac] sm:$0xf0] }
 0x10e   :  { %2140 = vmatpush.bf16.msrb.mxu0 %v3368_v38  ;;  %v3592_v38 = vor.u32 %v4187_v37, %v3591_v36  ;;  %v3784_v6 = vor.u32 %v4235_v4, %v3783_v3  ;;  %v4189_v37 = vld [vmem:[#allocation6 + $0x244] sm:$0xf] }
 0x10f   :  { %2153 = vmatpush.bf16.msrb.mxu1 %v3496_v41  ;;  %v4165_v41 = vld [vmem:[#allocation6 + $0x184] sm:$0xf] }
 0x111   :  { %2165 = vmatpush.bf16.msrb.mxu2 %v3640_v12  ;;  %v3468_v12 = vor.u32 %v4153_v7, %v3465_v8 }
 0x112   :  { %2141 = vmatpush.bf16.msrb.mxu0 %v3352_v11  ;;  %v3516_v11 = vor.u32 %v4165_v41, %v3513_v43  ;;  %v3439_v43 = vld [vmem:[#allocation6 + $0xe8] sm:$0xf] }
 0x113   :  { %2154 = vmatpush.bf16.msrb.mxu1 %v3480_v17  ;;  %v3815_v17 = vld [vmem:[#allocation6 + $0x3e0] sm:$0xf] }
 0x114   :  { %v3816_v51 = vor.u32 %v4243_v47, %v3815_v17 }
 0x115   :  { %2166 = vmatpush.bf16.msrb.mxu2 %v3624_v22  ;;  %v4197_v22 = vld [vmem:[#allocation6 + $0x284] sm:$0xf] }
 0x116   :  { %2142 = vmatpush.bf16.msrb.mxu0 %v3336_v46  ;;  %v3576_v46 = vor.u32 %v4183_v45, %v3575_v44  ;;  %2175 = vmatpush.bf16.msrb.mxu3 %v3816_v51  ;;  %v4219_v44 = vld [vmem:[#allocation6 + $0x32c] sm:$0xf0] }
 0x117   :  { %2155 = vmatpush.bf16.msrb.mxu1 %v3464_v0  ;;  %v3673_v0 = vld [vmem:[#allocation6 + $0x2d0] sm:$0xf0] }
 0x118   :  { %v3676_v2 = vor.u32 %v4205_v62, %v3673_v0  ;;  %v3577_v0 = vld [vmem:[#allocation6 + $0x210] sm:$0xf0] }
 0x119   :  { %2167 = vmatpush.bf16.msrb.mxu2 %v3608_v31  ;;  %v4193_v31 = vld [vmem:[#allocation6 + $0x264] sm:$0xf] }
 0x11a   :  { %2143 = vmatpush.bf16.msrb.mxu0 %v3320_v52  ;;  %v3500_v52 = vor.u32 %v4161_v49, %v3497_v50  ;;  %v3628_v33 = vor.u32 %v4193_v31, %v3625_v32  ;;  %v4185_v49 = vld [vmem:[#allocation6 + $0x224] sm:$0xf]  ;;  %v3593_v50 = vld [vmem:[#allocation6 + $0x230] sm:$0xf0]  ;;  %v4132_v31 = vld [vmem:[#allocation6 + $0x74] sm:$0xf0] }
 0x11b   :  { %2156 = vmatpush.bf16.msrb.mxu1 %v3448_v9  ;;  %v4201_v9 = vld [vmem:[#allocation6 + $0x2a4] sm:$0xf]  ;;  %v3567_v32 = vld [vmem:[#allocation6 + $0x1e8] sm:$0xf] }
 0x11c   :  { %v3660_v15 = vor.u32 %v4201_v9, %v3657_v13  ;;  %v3407_v9 = vld [vmem:[#allocation6 + $0xa8] sm:$0xf]  ;;  %v4140_v13 = vld [vmem:[#allocation6 + $0xb4] sm:$0xf0] }
 0x11d   :  { %2168 = vmatpush.bf16.msrb.mxu2 %v3592_v38  ;;  %v3609_v38 = vld [vmem:[#allocation6 + $0x250] sm:$0xf0] }
 0x11e   :  { %2188 = vmatpush.bf16.msra.mxu0 %v3436_v54  ;;  %v4209_v54 = vld [vmem:[#allocation6 + $0x2e4] sm:$0xf]  ;;  %v3612_v40 = vor.u32 %v4189_v37, %v3609_v38 }
 0x11f   :  { %2201 = vmatpush.bf16.msra.mxu1 %v3564_v21  ;;  %v3692_v56 = vor.u32 %v4209_v54, %v3689_v55  ;;  %v3449_v21 = vld [vmem:[#allocation6 + $0x110] sm:$0xf0]  ;;  %v494_v55 = vperm.slane %v4498_v1, 1 }
 0x120   :  { %v3452_v23 = vor.u32 %v4149_v20, %v3449_v21  ;;  %v3391_v20 = vld [vmem:[#allocation6 + $0x88] sm:$0xf] }
 0x121   :  { %2169 = vmatpush.bf16.msrb.mxu2 %v3576_v46  ;;  %v4148_v46 = vld [vmem:[#allocation6 + $0xf4] sm:$0xf0] }
 0x122   :  { %2189 = vmatpush.bf16.msra.mxu0 %v3420_v57  ;;  %v3799_v57 = vld [vmem:[#allocation6 + $0x3c0] sm:$0xf] }
 0x123   :  { %2202 = vmatpush.bf16.msra.mxu1 %v3548_v28  ;;  %v3800_v59 = vor.u32 %v4239_v58, %v3799_v57  ;;  %v4227_v28 = vld [vmem:[#allocation6 + $0x36c] sm:$0xf0]  ;;  %v3440_v57 = vor.u32 %v4148_v46, %v3439_v43  ;;  %v4144_v58 = vld [vmem:[#allocation6 + $0xd4] sm:$0xf0]  ;;  %v3551_v43 = vld [vmem:[#allocation6 + $0x1c8] sm:$0xf] }
 0x124   :  { %v3752_v30 = vor.u32 %v4227_v28, %v3751_v27  ;;  %v495_v46 = vperm.slane %v4498_v1, 2 }
 0x125   :  { %2214 = vmatpush.bf16.msra.mxu2 %v3692_v56  ;;  %2176 = vmatpush.bf16.msrb.mxu3 %v3800_v59  ;;  %v3423_v56 = vld [vmem:[#allocation6 + $0xc8] sm:$0xf]  ;;  %v3703_v59 = vld [vmem:[#allocation6 + $0x300] sm:$0xf] }
 0x126   :  { %2190 = vmatpush.bf16.msra.mxu0 %v3404_v60  ;;  %v4157_v60 = vld [vmem:[#allocation6 + $0x144] sm:$0xf]  ;;  %v3424_v8 = vor.u32 %v4144_v58, %v3423_v56  ;;  %v3535_v56 = vld [vmem:[#allocation6 + $0x1a8] sm:$0xf] }
 0x127   :  { %2203 = vmatpush.bf16.msra.mxu1 %v3532_v35  ;;  %v3484_v63 = vor.u32 %v4157_v60, %v3481_v61  ;;  %v4223_v35 = vld [vmem:[#allocation6 + $0x34c] sm:$0xf0]  ;;  %v4221_v58 = vld [vmem:[#allocation6 + $0x344] sm:$0xf] }
 0x128   :  { %v3736_v36 = vor.u32 %v4223_v35, %v3735_v34  ;;  %v4215_v60 = vld [vmem:[#allocation6 + $0x30c] sm:$0xf0]  ;;  %v3769_v34 = vld [vmem:[#allocation6 + $0x390] sm:$0xf0] }
 0x129   :  { %2215 = vmatpush.bf16.msra.mxu2 %v3676_v2  ;;  %2177 = vmatpush.bf16.msrb.mxu3 %v3784_v6  ;;  %v3704_v62 = vor.u32 %v4215_v60, %v3703_v59  ;;  %v4241_v2 = vld [vmem:[#allocation6 + $0x3e4] sm:$0xf]  ;;  %v3737_v59 = vld [vmem:[#allocation6 + $0x350] sm:$0xf0] }
 0x12a   :  { %2191 = vmatpush.bf16.msra.mxu0 %v3388_v5 }
 0x12b   :  { %2204 = vmatpush.bf16.msra.mxu1 %v3516_v11  ;;  %v3719_v11 = vld [vmem:[#allocation6 + $0x320] sm:$0xf] }
 0x12c   :  { %v3720_v47 = vor.u32 %v4219_v44, %v3719_v11  ;;  %v4176_v44 = vld [vmem:[#allocation6 + $0x1d4] sm:$0xf0] }
 0x12d   :  { %2216 = vmatpush.bf16.msra.mxu2 %v3660_v15  ;;  %v3801_v15 = vld [vmem:[#allocation6 + $0x3d0] sm:$0xf0] }
 0x12e   :  { %2192 = vmatpush.bf16.msra.mxu0 %v3372_v16  ;;  %v3767_v16 = vld [vmem:[#allocation6 + $0x380] sm:$0xf] }
 0x12f   :  { %2205 = vmatpush.bf16.msra.mxu1 %v3500_v52  ;;  %v3768_v19 = vor.u32 %v4231_v18, %v3767_v16  ;;  %v3596_v52 = vor.u32 %v4185_v49, %v3593_v50 }
 0x131   :  { %2178 = vmatpush.bf16.msrb.mxu3 %v3768_v19  ;;  %v3408_v19 = vor.u32 %v4140_v13, %v3407_v9  ;;  %v3721_v9 = vld [vmem:[#allocation6 + $0x330] sm:$0xf0]  ;;  %v3441_v13 = vld [vmem:[#allocation6 + $0xf8] sm:$0xf0] }
 0x132   :  { %2193 = vmatpush.bf16.msra.mxu0 %v3356_v26  ;;  %v3644_v26 = vor.u32 %v4197_v22, %v3641_v24  ;;  %v4136_v22 = vld [vmem:[#allocation6 + $0x94] sm:$0xf0]  ;;  %v3785_v24 = vld [vmem:[#allocation6 + $0x3b0] sm:$0xf0] }
 0x133   :  { %2206 = vmatpush.bf16.msra.mxu1 %v3484_v63  ;;  %v4181_v63 = vld [vmem:[#allocation6 + $0x204] sm:$0xf] }
 0x134   :  { %2217 = vmatpush.bf16.msra.mxu2 %v3644_v26  ;;  %v3580_v4 = vor.u32 %v4181_v63, %v3577_v0  ;;  %v3740_v63 = vor.u32 %v4221_v58, %v3737_v59  ;;  %v3647_v58 = vld [vmem:[#allocation6 + $0x288] sm:$0xf]  ;;  %v4200_v59 = vld [vmem:[#allocation6 + $0x294] sm:$0xf0] }
 0x135   :  { %2179 = vmatpush.bf16.msrb.mxu3 %v3752_v30  ;;  %v3375_v30 = vld [vmem:[#allocation6 + $0x68] sm:$0xf] }
 0x136   :  { %2194 = vmatpush.bf16.msra.mxu0 %v3340_v53 }
 0x137   :  { %2207 = vmatpush.bf16.msra.mxu1 %v3468_v12 }
 0x138   :  { %2218 = vmatpush.bf16.msra.mxu2 %v3628_v33  ;;  %v4180_v33 = vld [vmem:[#allocation6 + $0x1f4] sm:$0xf0] }
 0x139   :  { %v1150_v5 = vpop.f32.mrf.mxu0  ;;  %2180 = vmatpush.bf16.msrb.mxu3 %v3736_v36 }
 0x13a   :  { %2195 = vmatpush.bf16.msra.mxu0 %v3324_v42  ;;  %v1163_v10 = vpop.f32.mrf.mxu1  ;;  %v1151_v25 = vadd.f32 %v1150_v5, %v493_v14  ;;  %v3817_v5 = vld [vmem:[#allocation6 + $0x3f0] sm:$0xf0]  ;;  %v4237_v14 = vld [vmem:[#allocation6 + $0x3c4] sm:$0xf] }
 0x13b   :  { %2208 = vmatpush.bf16.msra.mxu1 %v3452_v23  ;;  %v3820_v7 = vor.u32 %v4241_v2, %v3817_v5  ;;  %v3804_v18 = vor.u32 %v4237_v14, %v3801_v15  ;;  %v4233_v23 = vld [vmem:[#allocation6 + $0x3a4] sm:$0xf]  ;;  %v4120_v5 = vld [vmem:[#allocation6 + $0x14] sm:$0xf0] }
 0x13c   :  { %v1164_v53 = vadd.f32 %v1163_v10, %v1151_v25  ;;  %2219 = vmatpush.bf16.msra.mxu2 %v3612_v40  ;;  %v3788_v26 = vor.u32 %v4233_v23, %v3785_v24  ;;  %v3568_v40 = vor.u32 %v4180_v33, %v3567_v32  ;;  %v3695_v24 = vld [vmem:[#allocation6 + $0x2e8] sm:$0xf] }
 0x13d   :  { %2181 = vmatpush.bf16.msrb.mxu3 %v3720_v47 }
 0x140   :  { %2220 = vmatpush.bf16.msra.mxu2 %v3596_v52  ;;  %v3552_v52 = vor.u32 %v4176_v44, %v3551_v43 }
 0x141   :  { %v1152_v29 = vpop.f32.mrf.mxu0  ;;  %2182 = vmatpush.bf16.msrb.mxu3 %v3704_v62 }
 0x142   :  { %v1165_v48 = vpop.f32.mrf.mxu1  ;;  %v3392_v29 = vor.u32 %v4136_v22, %v3391_v20  ;;  %v4164_v22 = vld [vmem:[#allocation6 + $0x174] sm:$0xf0] }
 0x144   :  { %2221 = vmatpush.bf16.msra.mxu2 %v3580_v4  ;;  %v3327_v4 = vld [vmem:[#allocation6 + $0x8] sm:$0xf] }
 0x145   :  { %2227 = vmatpush.bf16.msra.mxu3 %v3820_v7  ;;  %v4168_v7 = vld [vmem:[#allocation6 + $0x194] sm:$0xf0] }
 0x147   :  { %v1176_v39 = vpop.f32.mrf.mxu2 }
 0x148   :  { %v1177_v41 = vadd.f32 %v1176_v39, %v1164_v53  ;;  %v1189_v42 = vpop.f32.mrf.mxu3  ;;  %v4229_v53 = vld [vmem:[#allocation6 + $0x384] sm:$0xf]  ;;  %v3376_v39 = vor.u32 %v4132_v31, %v3375_v30  ;;  %v3425_v30 = vld [vmem:[#allocation6 + $0xd8] sm:$0xf0] }
 0x149   :  { %v1202_v17 = vpop.f32.mrf.mxu0  ;;  %2228 = vmatpush.bf16.msra.mxu3 %v3804_v18  ;;  %v3772_v36 = vor.u32 %v4229_v53, %v3769_v34  ;;  %v3487_v34 = vld [vmem:[#allocation6 + $0x148] sm:$0xf] }
 0x14a   :  { %v1190_v45 = vadd.f32 %v1189_v42, %v1177_v41  ;;  %v1215_v51 = vpop.f32.mrf.mxu1  ;;  %v1203_v10 = vadd.f32 %v1202_v17, %v494_v55  ;;  %v3359_v41 = vld [vmem:[#allocation6 + $0x48] sm:$0xf]  ;;  %v4128_v42 = vld [vmem:[#allocation6 + $0x54] sm:$0xf0]  ;;  %v3753_v17 = vld [vmem:[#allocation6 + $0x370] sm:$0xf0] }
 0x14b   :  { %v4124_v55 = vld [vmem:[#allocation6 + $0x34] sm:$0xf0] }
 0x14c   :  { %v1349_v54 = vmax.f32 %v1190_v45, 0.0  ;;  %v1216_v21 = vadd.f32 %v1215_v51, %v1203_v10  ;;  %v4225_v45 = vld [vmem:[#allocation6 + $0x364] sm:$0xf]  ;;  %v3360_v51 = vor.u32 %v4128_v42, %v3359_v41 }
 0x14d   :  { %2229 = vmatpush.bf16.msra.mxu3 %v3788_v26  ;;  %v3756_v49 = vor.u32 %v4225_v45, %v3753_v17  ;;  %v3705_v26 = vld [vmem:[#allocation6 + $0x310] sm:$0xf0]  ;;  %v3471_v17 = vld [vmem:[#allocation6 + $0x128] sm:$0xf] }
 0x14e   :  { %v4502_v61 = vpack.c.bf16 %v1349_v54, %v1349_v54  ;;  %v3343_v54 = vld [vmem:[#allocation6 + $0x28] sm:$0xf] }
 0x14f   :  { %v1178_v3 = vpop.f32.mrf.mxu2  ;;  %v3344_v2 = vor.u32 %v4124_v55, %v3343_v54 }
 0x150   :  { %v1191_v6 = vpop.f32.mrf.mxu3  ;;  %2144 = vmatmul.bf16.vlgmr.msrb.gmra.mxu0 %v4502_v61 }
 0x151   :  { %2240 = vmatpush.bf16.msrb.mxu0 %v3440_v57  ;;  %v1204_v12 = vpop.f32.mrf.mxu0  ;;  %2230 = vmatpush.bf16.msra.mxu3 %v3772_v36  ;;  %v4172_v57 = vld [vmem:[#allocation6 + $0x1b4] sm:$0xf0]  ;;  %v3519_v6 = vld [vmem:[#allocation6 + $0x188] sm:$0xf] }
 0x152   :  { %v1217_v16 = vpop.f32.mrf.mxu1  ;;  %v3536_v3 = vor.u32 %v4172_v57, %v3535_v56  ;;  %v4146_v12 = vld [vmem:[#allocation6 + $0xec] sm:$0xf]  ;;  %v3520_v20 = vor.u32 %v4168_v7, %v3519_v6  ;;  %v3679_v36 = vld [vmem:[#allocation6 + $0x2c8] sm:$0xf]  ;;  %v4152_v57 = vld [vmem:[#allocation6 + $0x114] sm:$0xf0]  ;;  %v3648_v6 = vor.u32 %v4200_v59, %v3647_v58 }
 0x153   :  { %v3444_v23 = vor.u32 %v4146_v12, %v3441_v13  ;;  %v3455_v56 = vld [vmem:[#allocation6 + $0x108] sm:$0xf]  ;;  %v4126_v12 = vld [vmem:[#allocation6 + $0x4c] sm:$0xf]  ;;  %v3361_v13 = vld [vmem:[#allocation6 + $0x58] sm:$0xf0] }
 0x154   :  { %v3807_v59 = vld [vmem:[#allocation6 + $0x3c8] sm:$0xf] }
 0x155   :  { %2241 = vmatpush.bf16.msrb.mxu0 %v3424_v8  ;;  %2231 = vmatpush.bf16.msra.mxu3 %v3756_v49  ;;  %v4217_v8 = vld [vmem:[#allocation6 + $0x324] sm:$0xf]  ;;  %v4204_v49 = vld [vmem:[#allocation6 + $0x2b4] sm:$0xf0] }
 0x156   :  { %v3724_v14 = vor.u32 %v4217_v8, %v3721_v9  ;;  %v3631_v8 = vld [vmem:[#allocation6 + $0x268] sm:$0xf] }
 0x157   :  { %v1228_v25 = vpop.f32.mrf.mxu2 }
 0x158   :  { %v1229_v27 = vadd.f32 %v1228_v25, %v1216_v21  ;;  %v1241_v28 = vpop.f32.mrf.mxu3  ;;  %v3503_v21 = vld [vmem:[#allocation6 + $0x168] sm:$0xf]  ;;  %v4213_v25 = vld [vmem:[#allocation6 + $0x304] sm:$0xf] }
 0x159   :  { %2242 = vmatpush.bf16.msrb.mxu0 %v3408_v19  ;;  %2232 = vmatpush.bf16.msra.mxu3 %v3740_v63  ;;  %v3328_v19 = vor.u32 %v4120_v5, %v3327_v4  ;;  %v3708_v31 = vor.u32 %v4213_v25, %v3705_v26  ;;  %v3456_v4 = vor.u32 %v4152_v57, %v3455_v56  ;;  %v496_v5 = vperm.slane %v4498_v1, 3  ;;  %v4170_v25 = vld [vmem:[#allocation6 + $0x1ac] sm:$0xf]  ;;  %v3537_v26 = vld [vmem:[#allocation6 + $0x1b8] sm:$0xf0] }
 0x15a   :  { %v1242_v48 = vadd.f32 %v1241_v28, %v1229_v27  ;;  %v1254_v35 = vpop.f32.mrf.mxu0  ;;  %v4212_v28 = vld [vmem:[#allocation6 + $0x2f4] sm:$0xf0] }
 0x15b   :  { %v1255_v60 = vadd.f32 %v1254_v35, %v495_v46  ;;  %v3696_v33 = vor.u32 %v4212_v28, %v3695_v24  ;;  %v4160_v35 = vld [vmem:[#allocation6 + $0x154] sm:$0xf0] }
 0x15c   :  { %v1350_v37 = vmax.f32 %v1242_v48, 0.0  ;;  %v3504_v48 = vor.u32 %v4164_v22, %v3503_v21  ;;  %v3488_v43 = vor.u32 %v4160_v35, %v3487_v34  ;;  %v4156_v46 = vld [vmem:[#allocation6 + $0x134] sm:$0xf0]  ;;  %v4122_v22 = vld [vmem:[#allocation6 + $0x2c] sm:$0xf] }
 0x15d   :  { %v1267_v38 = vpop.f32.mrf.mxu1  ;;  %2243 = vmatpush.bf16.msrb.mxu0 %v3392_v29  ;;  %2233 = vmatpush.bf16.msra.mxu3 %v3724_v14  ;;  %v4142_v29 = vld [vmem:[#allocation6 + $0xcc] sm:$0xf]  ;;  %v4192_v21 = vld [vmem:[#allocation6 + $0x254] sm:$0xf0] }
 0x15e   :  { %v4505_v11 = vpack.c.bf16 %v1350_v37, %v1350_v37  ;;  %v1268_v10 = vadd.f32 %v1267_v38, %v1255_v60  ;;  %v3428_v53 = vor.u32 %v4142_v29, %v3425_v30  ;;  %v4208_v38 = vld [vmem:[#allocation6 + $0x2d4] sm:$0xf0]  ;;  %v4130_v60 = vld [vmem:[#allocation6 + $0x6c] sm:$0xf]  ;;  %v3599_v30 = vld [vmem:[#allocation6 + $0x228] sm:$0xf] }
 0x15f   :  { %v1230_v47 = vpop.f32.mrf.mxu2  ;;  %v3680_v44 = vor.u32 %v4208_v38, %v3679_v36  ;;  %v4174_v14 = vld [vmem:[#allocation6 + $0x1cc] sm:$0xf]  ;;  %v3521_v36 = vld [vmem:[#allocation6 + $0x198] sm:$0xf0] }
 0x160   :  { %v1243_v50 = vpop.f32.mrf.mxu3  ;;  %2157 = vmatmul.bf16.vlgmr.msrb.gmra.mxu1 %v4505_v11  ;;  %2196 = vmatmul.bf16.vlgmr.msra.gmra.mxu0 %v4502_v61  ;;  %v3663_v47 = vld [vmem:[#allocation6 + $0x2a8] sm:$0xf]  ;;  %v4166_v35 = vld [vmem:[#allocation6 + $0x18c] sm:$0xf] }
 0x161   :  { %2244 = vmatpush.bf16.msrb.mxu0 %v3376_v39  ;;  %2253 = vmatpush.bf16.msrb.mxu1 %v3568_v40  ;;  %v4138_v39 = vld [vmem:[#allocation6 + $0xac] sm:$0xf]  ;;  %v3409_v40 = vld [vmem:[#allocation6 + $0xb8] sm:$0xf0]  ;;  %v3664_v54 = vor.u32 %v4204_v49, %v3663_v47 }
 0x162   :  { %v1256_v62 = vpop.f32.mrf.mxu0  ;;  %2234 = vmatpush.bf16.msra.mxu3 %v3708_v31  ;;  %v3412_v45 = vor.u32 %v4138_v39, %v3409_v40  ;;  %v4134_v50 = vld [vmem:[#allocation6 + $0x8c] sm:$0xf]  ;;  %v3505_v49 = vld [vmem:[#allocation6 + $0x178] sm:$0xf0] }
 0x163   :  { %v3377_v62 = vld [vmem:[#allocation6 + $0x78] sm:$0xf0]  ;;  %v4162_v47 = vld [vmem:[#allocation6 + $0x16c] sm:$0xf] }
 0x164   :  { %v3380_v7 = vor.u32 %v4130_v60, %v3377_v62  ;;  %v3508_v57 = vor.u32 %v4162_v47, %v3505_v49  ;;  %v4240_v60 = vld [vmem:[#allocation6 + $0x3d4] sm:$0xf0]  ;;  %v4158_v62 = vld [vmem:[#allocation6 + $0x14c] sm:$0xf]  ;;  %v3825_v47 = vld [vmem:[#allocation6 + $0x3f8] sm:$0xf0] }
 0x165   :  { %v1269_v0 = vpop.f32.mrf.mxu1  ;;  %2245 = vmatpush.bf16.msrb.mxu0 %v3360_v51  ;;  %2254 = vmatpush.bf16.msrb.mxu1 %v3552_v52  ;;  %v3393_v51 = vld [vmem:[#allocation6 + $0x98] sm:$0xf0]  ;;  %v3472_v52 = vor.u32 %v4156_v46, %v3471_v17  ;;  %v3823_v17 = vld [vmem:[#allocation6 + $0x3e8] sm:$0xf]  ;;  %v4244_v46 = vld [vmem:[#allocation6 + $0x3f4] sm:$0xf0] }
 0x166   :  { %v3396_v55 = vor.u32 %v4134_v50, %v3393_v51  ;;  %v4178_v0 = vld [vmem:[#allocation6 + $0x1ec] sm:$0xf]  ;;  %v3697_v51 = vld [vmem:[#allocation6 + $0x2f8] sm:$0xf0] }
 0x167   :  { %v1280_v15 = vpop.f32.mrf.mxu2  ;;  %v4210_v50 = vld [vmem:[#allocation6 + $0x2ec] sm:$0xf] }
 0x168   :  { %v1293_v16 = vpop.f32.mrf.mxu3  ;;  %v1281_v18 = vadd.f32 %v1280_v15, %v1268_v10  ;;  %v4196_v10 = vld [vmem:[#allocation6 + $0x274] sm:$0xf0]  ;;  %v3553_v15 = vld [vmem:[#allocation6 + $0x1d8] sm:$0xf0]  ;;  %v3700_v58 = vor.u32 %v4210_v50, %v3697_v51  ;;  %v4238_v51 = vld [vmem:[#allocation6 + $0x3cc] sm:$0xf] }
 0x169   :  { %2246 = vmatpush.bf16.msrb.mxu0 %v3344_v2  ;;  %2255 = vmatpush.bf16.msrb.mxu1 %v3536_v3  ;;  %v3569_v2 = vld [vmem:[#allocation6 + $0x1f8] sm:$0xf0]  ;;  %v3556_v1 = vor.u32 %v4174_v14, %v3553_v15 }
 0x16a   :  { %v1294_v27 = vadd.f32 %v1293_v16, %v1281_v18  ;;  %v3572_v9 = vor.u32 %v4178_v0, %v3569_v2  ;;  %v3632_v16 = vor.u32 %v4196_v10, %v3631_v8  ;;  %v3364_v18 = vor.u32 %v4126_v12, %v3361_v13  ;;  %v3489_v0 = vld [vmem:[#allocation6 + $0x158] sm:$0xf0]  ;;  %v4206_v2 = vld [vmem:[#allocation6 + $0x2cc] sm:$0xf]  ;;  %v3791_v8 = vld [vmem:[#allocation6 + $0x3a8] sm:$0xf] }
 0x16b   :  { %v4154_v10 = vld [vmem:[#allocation6 + $0x12c] sm:$0xf]  ;;  %v3473_v12 = vld [vmem:[#allocation6 + $0x138] sm:$0xf0] }
 0x16c   :  { %v1351_v32 = vmax.f32 %v1294_v27, 0.0  ;;  %v4202_v13 = vld [vmem:[#allocation6 + $0x2ac] sm:$0xf]  ;;  %v3665_v14 = vld [vmem:[#allocation6 + $0x2b8] sm:$0xf0] }
 0x16d   :  { %2247 = vmatpush.bf16.msrb.mxu0 %v3328_v19  ;;  %2256 = vmatpush.bf16.msrb.mxu1 %v3520_v20  ;;  %v3615_v19 = vld [vmem:[#allocation6 + $0x248] sm:$0xf] }
 0x16e   :  { %v4510_v37 = vpack.c.bf16 %v1351_v32, %v1351_v32  ;;  %v3616_v28 = vor.u32 %v4192_v21, %v3615_v19  ;;  %v3540_v32 = vor.u32 %v4170_v25, %v3537_v26  ;;  %v4232_v19 = vld [vmem:[#allocation6 + $0x394] sm:$0xf0]  ;;  %v4198_v21 = vld [vmem:[#allocation6 + $0x28c] sm:$0xf]  ;;  %v3759_v26 = vld [vmem:[#allocation6 + $0x368] sm:$0xf] }
 0x16f   :  { %v1282_v41 = vpop.f32.mrf.mxu2 }
 0x170   :  { %v1295_v42 = vpop.f32.mrf.mxu3  ;;  %2209 = vmatmul.bf16.vlgmr.msra.gmra.mxu1 %v4505_v11  ;;  %2248 = vmatmul.bf16.vlgmr.msrb.gmra.mxu0 %v4502_v61 }
 0x171   :  { %2292 = vmatpush.bf16.msra.mxu0 %v3444_v23  ;;  %2170 = vmatmul.bf16.vlgmr.msrb.gmra.mxu2 %v4510_v37  ;;  %v3345_v23 = vld [vmem:[#allocation6 + $0x38] sm:$0xf0]  ;;  %v3583_v42 = vld [vmem:[#allocation6 + $0x208] sm:$0xf] }
 0x172   :  { %2257 = vmatpush.bf16.msrb.mxu1 %v3504_v48  ;;  %2266 = vmatpush.bf16.msrb.mxu2 %v3696_v33  ;;  %v3348_v29 = vor.u32 %v4122_v22, %v3345_v23  ;;  %v4188_v48 = vld [vmem:[#allocation6 + $0x234] sm:$0xf0]  ;;  %v4118_v33 = vld [vmem:[#allocation6 + $0xc] sm:$0xf]  ;;  %v3649_v22 = vld [vmem:[#allocation6 + $0x298] sm:$0xf0] }
 0x173   :  { %v3600_v40 = vor.u32 %v4188_v48, %v3599_v30  ;;  %v3652_v25 = vor.u32 %v4198_v21, %v3649_v22  ;;  %v4224_v48 = vld [vmem:[#allocation6 + $0x354] sm:$0xf0] }
 0x174   :  { %v4248_v21 = vld [vmem:[#allocation7 + $0x18] sm:$0xff] }
 0x175   :  { %2293 = vmatpush.bf16.msra.mxu0 %v3428_v53  ;;  %v3329_v53 = vld [vmem:[#allocation6 + $0x18] sm:$0xf0] }
 0x176   :  { %2258 = vmatpush.bf16.msrb.mxu1 %v3488_v43  ;;  %2267 = vmatpush.bf16.msrb.mxu2 %v3680_v44  ;;  %v3332_v41 = vor.u32 %v4118_v33, %v3329_v53  ;;  %v4184_v43 = vld [vmem:[#allocation6 + $0x214] sm:$0xf0]  ;;  %v4190_v33 = vld [vmem:[#allocation6 + $0x24c] sm:$0xf]  ;;  %v3617_v53 = vld [vmem:[#allocation6 + $0x258] sm:$0xf0] }
 0x177   :  { %v4260_v22 = vld [vmem:[#allocation7 + $0x78] sm:$0xff] }
 0x179   :  { %2294 = vmatpush.bf16.msra.mxu0 %v3412_v45  ;;  %v3524_v45 = vor.u32 %v4166_v35, %v3521_v36  ;;  %v3620_v35 = vor.u32 %v4190_v33, %v3617_v53  ;;  %v3727_v36 = vld [vmem:[#allocation6 + $0x328] sm:$0xf]  ;;  %v4268_v33 = vld [vmem:[#allocation7 + $0xb8] sm:$0xff]  ;;  %v4255_v53 = vld [vmem:[#allocation7 + $0x50] sm:$0xff] }
 0x17a   :  { %v1306_v63 = vpop.f32.mrf.mxu0  ;;  %2259 = vmatpush.bf16.msrb.mxu1 %v3472_v52  ;;  %2268 = vmatpush.bf16.msrb.mxu2 %v3664_v54  ;;  %v3584_v54 = vor.u32 %v4184_v43, %v3583_v42  ;;  %v3711_v43 = vld [vmem:[#allocation6 + $0x308] sm:$0xf] }
 0x17b   :  { %v1307_v20 = vadd.f32 %v1306_v63, %v496_v5  ;;  %v3808_v5 = vor.u32 %v4240_v60, %v3807_v59  ;;  %v4230_v59 = vld [vmem:[#allocation6 + $0x38c] sm:$0xf]  ;;  %v3777_v60 = vld [vmem:[#allocation6 + $0x398] sm:$0xf0] }
 0x17d   :  { %v1319_v3 = vpop.f32.mrf.mxu1  ;;  %2295 = vmatpush.bf16.msra.mxu0 %v3396_v55  ;;  %v3824_v55 = vor.u32 %v4244_v46, %v3823_v17  ;;  %v3585_v17 = vld [vmem:[#allocation6 + $0x218] sm:$0xf0]  ;;  %v4242_v46 = vld [vmem:[#allocation6 + $0x3ec] sm:$0xf] }
 0x17e   :  { %2260 = vmatpush.bf16.msrb.mxu1 %v3456_v4  ;;  %2269 = vmatpush.bf16.msrb.mxu2 %v3648_v6  ;;  %v1320_v31 = vadd.f32 %v1319_v3, %v1307_v20  ;;  %v3681_v3 = vld [vmem:[#allocation6 + $0x2d8] sm:$0xf0]  ;;  %v3492_v6 = vor.u32 %v4158_v62, %v3489_v0  ;;  %v4150_v20 = vld [vmem:[#allocation6 + $0x10c] sm:$0xf]  ;;  %v3828_v50 = vor.u32 %v4242_v46, %v3825_v47  ;;  %v4263_v46 = vld [vmem:[#allocation7 + $0x90] sm:$0xff] }
 0x17f   :  { %v3780_v62 = vor.u32 %v4230_v59, %v3777_v60  ;;  %v3761_v0 = vld [vmem:[#allocation6 + $0x378] sm:$0xf0]  ;;  %v4261_v59 = vld [vmem:[#allocation7 + $0x80] sm:$0xff] }
 0x180   :  { %v4276_v60 = vld [vmem:[#allocation7 + $0xf8] sm:$0xff] }
 0x181   :  { %2296 = vmatpush.bf16.msra.mxu0 %v3380_v7  ;;  %2261 = vmatmul.bf16.vlgmr.msrb.gmra.mxu1 %v4505_v11  ;;  %v3684_v7 = vor.u32 %v4206_v2, %v3681_v3  ;;  %v4222_v3 = vld [vmem:[#allocation6 + $0x34c] sm:$0xf] }
 0x182   :  { %2305 = vmatpush.bf16.msra.mxu1 %v3572_v9  ;;  %v1308_v24 = vpop.f32.mrf.mxu0  ;;  %2222 = vmatmul.bf16.vlgmr.msra.gmra.mxu2 %v4510_v37  ;;  %v4236_v9 = vld [vmem:[#allocation6 + $0x3b4] sm:$0xf0] }
 0x183   :  { %2270 = vmatpush.bf16.msrb.mxu2 %v3632_v16  ;;  %v3792_v15 = vor.u32 %v4236_v9, %v3791_v8  ;;  %v3668_v16 = vor.u32 %v4202_v13, %v3665_v14  ;;  %v4214_v9 = vld [vmem:[#allocation6 + $0x30c] sm:$0xf]  ;;  %v4252_v14 = vld [vmem:[#allocation7 + $0x38] sm:$0xff] }
 0x185   :  { %v1321_v27 = vpop.f32.mrf.mxu1  ;;  %2297 = vmatpush.bf16.msra.mxu0 %v3364_v18  ;;  %v3775_v18 = vld [vmem:[#allocation6 + $0x388] sm:$0xf] }
 0x186   :  { %2306 = vmatpush.bf16.msra.mxu1 %v3556_v1  ;;  %v3457_v1 = vld [vmem:[#allocation6 + $0x118] sm:$0xf0]  ;;  %v3776_v23 = vor.u32 %v4232_v19, %v3775_v18  ;;  %v4228_v27 = vld [vmem:[#allocation6 + $0x374] sm:$0xf0]  ;;  %v4250_v18 = vld [vmem:[#allocation7 + $0x28] sm:$0xff] }
 0x187   :  { %v1332_v34 = vpop.f32.mrf.mxu2  ;;  %2271 = vmatpush.bf16.msrb.mxu2 %v3616_v28  ;;  %v3460_v24 = vor.u32 %v4150_v20, %v3457_v1  ;;  %v4194_v28 = vld [vmem:[#allocation6 + $0x26c] sm:$0xf]  ;;  %v3760_v30 = vor.u32 %v4228_v27, %v3759_v26  ;;  %v4249_v19 = vld [vmem:[#allocation7 + $0x20] sm:$0xff] }
 0x188   :  { %v1333_v38 = vadd.f32 %v1332_v34, %v1320_v31  ;;  %v1345_v39 = vpop.f32.mrf.mxu3  ;;  %v4246_v26 = vld [vmem:[#allocation7 + $0x8] sm:$0xff] }
 0x189   :  { %2298 = vmatpush.bf16.msra.mxu0 %v3348_v29  ;;  %v3633_v29 = vld [vmem:[#allocation6 + $0x278] sm:$0xf0]  ;;  %v4258_v27 = vld [vmem:[#allocation7 + $0x68] sm:$0xff] }
 0x18a   :  { %v1346_v44 = vadd.f32 %v1345_v39, %v1333_v38  ;;  %2307 = vmatpush.bf16.msra.mxu1 %v3540_v32  ;;  %v3636_v31 = vor.u32 %v4194_v28, %v3633_v29  ;;  %v3743_v32 = vld [vmem:[#allocation6 + $0x348] sm:$0xf]  ;;  %v4220_v38 = vld [vmem:[#allocation6 + $0x334] sm:$0xf0]  ;;  %v4186_v39 = vld [vmem:[#allocation6 + $0x22c] sm:$0xf] }
 0x18b   :  { %2272 = vmatpush.bf16.msrb.mxu2 %v3600_v40  ;;  %v3744_v34 = vor.u32 %v4224_v48, %v3743_v32  ;;  %v3601_v40 = vld [vmem:[#allocation6 + $0x238] sm:$0xf0]  ;;  %v4245_v28 = vld [vmem:[#allocation7] sm:$0xff] }
 0x18c   :  { %v1352_v52 = vmax.f32 %v1346_v44, 0.0  ;;  %v3604_v42 = vor.u32 %v4186_v39, %v3601_v40  ;;  %v4216_v44 = vld [vmem:[#allocation6 + $0x314] sm:$0xf0]  ;;  %v4257_v29 = vld [vmem:[#allocation7 + $0x60] sm:$0xff]  ;;  %v4266_v39 = vld [vmem:[#allocation7 + $0xa8] sm:$0xff] }
 0x18d   :  { %2299 = vmatpush.bf16.msra.mxu0 %v3332_v41  ;;  %v3728_v41 = vor.u32 %v4220_v38, %v3727_v36  ;;  %v3712_v49 = vor.u32 %v4216_v44, %v3711_v43  ;;  %v4256_v48 = vld [vmem:[#allocation7 + $0x58] sm:$0xff]  ;;  %v4254_v38 = vld [vmem:[#allocation7 + $0x48] sm:$0xff]  ;;  %v4253_v40 = vld [vmem:[#allocation7 + $0x40] sm:$0xff] }
 0x18e   :  { %v4518_v56 = vpack.c.bf16 %v1352_v52, %v1352_v52  ;;  %2308 = vmatpush.bf16.msra.mxu1 %v3524_v45  ;;  %v4182_v45 = vld [vmem:[#allocation6 + $0x20c] sm:$0xf]  ;;  %v3809_v52 = vld [vmem:[#allocation6 + $0x3d8] sm:$0xf0] }
 0x18f   :  { %v1334_v63 = vpop.f32.mrf.mxu2  ;;  %2273 = vmatpush.bf16.msrb.mxu2 %v3584_v54  ;;  %v3812_v54 = vor.u32 %v4238_v51, %v3809_v52  ;;  %v4262_v52 = vld [vmem:[#allocation7 + $0x88] sm:$0xff] }
 0x190   :  { %v1347_v4 = vpop.f32.mrf.mxu3  ;;  %2183 = vmatmul.bf16.vlgmr.msrb.gmra.mxu3 %v4518_v56  ;;  %2300 = vmatmul.bf16.vlgmr.msra.gmra.mxu0 %v4502_v61  ;;  %v3476_v61 = vor.u32 %v4154_v10, %v3473_v12  ;;  %v4226_v63 = vld [vmem:[#allocation6 + $0x36c] sm:$0xf] }
 0x191   :  { %2279 = vmatpush.bf16.msrb.mxu3 %v3824_v55  ;;  %v4234_v55 = vld [vmem:[#allocation6 + $0x3ac] sm:$0xf]  ;;  %v3764_v2 = vor.u32 %v4226_v63, %v3761_v0  ;;  %v3745_v4 = vld [vmem:[#allocation6 + $0x358] sm:$0xf0]  ;;  %2609 = vmatpush.bf16.msrb.mxu0 %v4252_v14 }
 0x192   :  { %2309 = vmatpush.bf16.msra.mxu1 %v3508_v57  ;;  %2274 = vmatmul.bf16.vlgmr.msrb.gmra.mxu2 %v4510_v37  ;;  %v3793_v57 = vld [vmem:[#allocation6 + $0x3b8] sm:$0xf0] }
 0x193   :  { %2318 = vmatpush.bf16.msra.mxu2 %v3700_v58  ;;  %v3796_v58 = vor.u32 %v4234_v55, %v3793_v57 }
 0x195   :  { %2280 = vmatpush.bf16.msrb.mxu3 %v3808_v5  ;;  %v3748_v5 = vor.u32 %v4222_v3, %v3745_v4  ;;  %v4274_v4 = vld [vmem:[#allocation7 + $0xe8] sm:$0xff] }
 0x196   :  { %2310 = vmatpush.bf16.msra.mxu1 %v3492_v6  ;;  %v4218_v6 = vld [vmem:[#allocation6 + $0x32c] sm:$0xf] }
 0x197   :  { %2319 = vmatpush.bf16.msra.mxu2 %v3684_v7  ;;  %v3729_v7 = vld [vmem:[#allocation6 + $0x338] sm:$0xf0] }
 0x198   :  { %v3732_v8 = vor.u32 %v4218_v6, %v3729_v7 }
 0x199   :  { %2281 = vmatpush.bf16.msrb.mxu3 %v3792_v15  ;;  %v4251_v15 = vld [vmem:[#allocation7 + $0x30] sm:$0xff] }
 0x19a   :  { %2311 = vmatpush.bf16.msra.mxu1 %v3476_v61  ;;  %2610 = vmatpush.bf16.msrb.mxu0 %v4251_v15 }
 0x19b   :  { %2320 = vmatpush.bf16.msra.mxu2 %v3668_v16 }
 0x19d   :  { %2282 = vmatpush.bf16.msrb.mxu3 %v3776_v23  ;;  %v4259_v23 = vld [vmem:[#allocation7 + $0x70] sm:$0xff] }
 0x19e   :  { %2312 = vmatpush.bf16.msra.mxu1 %v3460_v24  ;;  %2611 = vmatpush.bf16.msrb.mxu0 %v4250_v18  ;;  %v4271_v18 = vld [vmem:[#allocation7 + $0xd0] sm:$0xff] }
 0x19f   :  { %2321 = vmatpush.bf16.msra.mxu2 %v3652_v25 }
 0x1a0   :  { %2235 = vmatmul.bf16.vlgmr.msra.gmra.mxu3 %v4518_v56 }
 0x1a1   :  { %2283 = vmatpush.bf16.msrb.mxu3 %v3760_v30  ;;  %2313 = vmatmul.bf16.vlgmr.msra.gmra.mxu1 %v4505_v11  ;;  %v3588_v11 = vor.u32 %v4182_v45, %v3585_v17  ;;  %v4264_v17 = vld [vmem:[#allocation7 + $0x98] sm:$0xff] }
 0x1a2   :  { %2612 = vmatpush.bf16.msrb.mxu0 %v4249_v19  ;;  %2622 = vmatpush.bf16.msrb.mxu1 %v4260_v22 }
 0x1a3   :  { %2322 = vmatpush.bf16.msra.mxu2 %v3636_v31 }
 0x1a5   :  { %2284 = vmatpush.bf16.msrb.mxu3 %v3744_v34  ;;  %v4267_v34 = vld [vmem:[#allocation7 + $0xb0] sm:$0xff] }
 0x1a6   :  { %2613 = vmatpush.bf16.msrb.mxu0 %v4248_v21  ;;  %2623 = vmatpush.bf16.msrb.mxu1 %v4259_v23 }
 0x1a7   :  { %2323 = vmatpush.bf16.msra.mxu2 %v3620_v35 }
 0x1a9   :  { %2285 = vmatpush.bf16.msrb.mxu3 %v3728_v41  ;;  %v4265_v41 = vld [vmem:[#allocation7 + $0xa0] sm:$0xff] }
 0x1aa   :  { %2624 = vmatpush.bf16.msrb.mxu1 %v4258_v27 }
 0x1ab   :  { %2324 = vmatpush.bf16.msra.mxu2 %v3604_v42  ;;  %v4536_v42 = vld [vmem:[#allocation9 + $0x2] ss:$8 sm:$0xf] }
 0x1ac   :  { %v1488_v45 = vperm.slane %v4536_v42, 0  ;;  %v1489_v0 = vperm.slane %v4536_v42, 1  ;;  %v1490_v19 = vperm.slane %v4536_v42, 2 }
 0x1ad   :  { %2286 = vmatpush.bf16.msrb.mxu3 %v3712_v49 }
 0x1ae   :  { %2625 = vmatpush.bf16.msrb.mxu1 %v4257_v29 }
 0x1af   :  { %2325 = vmatpush.bf16.msra.mxu2 %v3588_v11 }
 0x1b0   :  { %2287 = vmatmul.bf16.vlgmr.msrb.gmra.mxu3 %v4518_v56 }
 0x1b1   :  { %2331 = vmatpush.bf16.msra.mxu3 %v3828_v50 }
 0x1b2   :  { %2326 = vmatmul.bf16.vlgmr.msra.gmra.mxu2 %v4510_v37  ;;  %v3713_v37 = vld [vmem:[#allocation6 + $0x318] sm:$0xf0]  ;;  %2626 = vmatpush.bf16.msrb.mxu1 %v4256_v48 }
 0x1b3   :  { %v3716_v10 = vor.u32 %v4214_v9, %v3713_v37  ;;  %2635 = vmatpush.bf16.msrb.mxu2 %v4268_v33  ;;  %v4273_v9 = vld [vmem:[#allocation7 + $0xe0] sm:$0xff] }
 0x1b5   :  { %2332 = vmatpush.bf16.msra.mxu3 %v3812_v54 }
 0x1b6   :  { %2627 = vmatpush.bf16.msrb.mxu1 %v4255_v53 }
 0x1b7   :  { %2636 = vmatpush.bf16.msrb.mxu2 %v4267_v34 }
 0x1b9   :  { %2333 = vmatpush.bf16.msra.mxu3 %v3796_v58 }
 0x1ba   :  { %2628 = vmatpush.bf16.msrb.mxu1 %v4254_v38 }
 0x1bb   :  { %2637 = vmatpush.bf16.msrb.mxu2 %v4266_v39 }
 0x1bd   :  { %2334 = vmatpush.bf16.msra.mxu3 %v3780_v62 }
 0x1be   :  { %2629 = vmatpush.bf16.msrb.mxu1 %v4253_v40 }
 0x1bf   :  { %2638 = vmatpush.bf16.msrb.mxu2 %v4265_v41 }
 0x1c1   :  { %2335 = vmatpush.bf16.msra.mxu3 %v3764_v2  ;;  %v4275_v2 = vld [vmem:[#allocation7 + $0xf0] sm:$0xff] }
 0x1c3   :  { %2639 = vmatpush.bf16.msrb.mxu2 %v4264_v17  ;;  %v2661_v17 = vlaneseq }
 0x1c5   :  { %2336 = vmatpush.bf16.msra.mxu3 %v3748_v5 }
 0x1c7   :  { %2640 = vmatpush.bf16.msrb.mxu2 %v4263_v46 }
 0x1c9   :  { %2337 = vmatpush.bf16.msra.mxu3 %v3732_v8 }
 0x1cb   :  { %2641 = vmatpush.bf16.msrb.mxu2 %v4262_v52 }
 0x1cd   :  { %2338 = vmatpush.bf16.msra.mxu3 %v3716_v10  ;;  %v2145_v12 = vpop.f32.mrf.mxu0 }
 0x1ce   :  { %v2146_v49 = vadd.f32 %v2145_v12, %v1488_v45  ;;  %v2416_v45 = vld [vmem:[#allocation9 + $0x3] ss:$0 sm:$0xff] }
 0x1cf   :  { %2642 = vmatpush.bf16.msrb.mxu2 %v4261_v59 }
 0x1d0   :  { %2339 = vmatmul.bf16.vlgmr.msra.gmra.mxu3 %v4518_v56  ;;  %v4247_v56 = vld [vmem:[#allocation7 + $0x10] sm:$0xff] }
 0x1d1   :  { %2614 = vmatpush.bf16.msrb.mxu0 %v4247_v56  ;;  %2648 = vmatpush.bf16.msrb.mxu3 %v4276_v60  ;;  %v4269_v56 = vld [vmem:[#allocation7 + $0xc0] sm:$0xff] }
 0x1d5   :  { %v2147_v13 = vpop.f32.mrf.mxu0  ;;  %2615 = vmatpush.bf16.msrb.mxu0 %v4246_v26  ;;  %2649 = vmatpush.bf16.msrb.mxu3 %v4275_v2 }
 0x1d6   :  { %v4272_v13 = vld [vmem:[#allocation7 + $0xd8] sm:$0xff] }
 0x1d9   :  { %2616 = vmatpush.bf16.msrb.mxu0 %v4245_v28  ;;  %2650 = vmatpush.bf16.msrb.mxu3 %v4274_v4 }
 0x1dd   :  { %v2158_v61 = vpop.f32.mrf.mxu1  ;;  %v4528_v16 = vpop.f32.mrf.mxu0  ;;  %2651 = vmatpush.bf16.msrb.mxu3 %v4273_v9 }
 0x1de   :  { %v2159_v50 = vadd.f32 %v2158_v61, %v2146_v49  ;;  %v2198_v5 = vadd.f32 %v4528_v16, %v1489_v0 }
 0x1e1   :  { %2652 = vmatpush.bf16.msrb.mxu3 %v4272_v13 }
 0x1e5   :  { %v2160_v20 = vpop.f32.mrf.mxu1  ;;  %v2199_v1 = vpop.f32.mrf.mxu0  ;;  %2653 = vmatpush.bf16.msrb.mxu3 %v4271_v18 }
 0x1e6   :  { %v4270_v1 = vld [vmem:[#allocation7 + $0xc8] sm:$0xff] }
 0x1e9   :  { %2654 = vmatpush.bf16.msrb.mxu3 %v4270_v1 }
 0x1ed   :  { %v4530_v24 = vpop.f32.mrf.mxu1  ;;  %v4532_v25 = vpop.f32.mrf.mxu0  ;;  %2655 = vmatpush.bf16.msrb.mxu3 %v4269_v56 }
 0x1ee   :  { %v2211_v8 = vadd.f32 %v4530_v24, %v2198_v5  ;;  %v2250_v20 = vadd.f32 %v4532_v25, %v1490_v19 }
 0x1f4   :  { %v2171_v30 = vpop.f32.mrf.mxu2 }
 0x1f5   :  { %v2212_v31 = vpop.f32.mrf.mxu1  ;;  %v2251_v32 = vpop.f32.mrf.mxu0  ;;  %v2172_v51 = vadd.f32 %v2171_v30, %v2159_v50 }
 0x1f6   :  { %v1491_v31 = vperm.slane %v4536_v42, 3  ;;  %v2662_v42 = vand.u32 127, %v2661_v17 }
 0x1f8   :  { %vm2663_vm0 = vcmp.ge.s32.totalorder %v2662_v42, 2  ;;  %vm2664_vm1 = vcmp.lt.s32.totalorder %v2662_v42, 4 }
 0x1f9   :  { %vm2665_vm2 = vmand %vm2663_vm0, %vm2664_vm1 }
 0x1fc   :  { %v2173_v35 = vpop.f32.mrf.mxu2 }
 0x1fe   :  { %v4534_v36 = vpop.f32.mrf.mxu1 }
 0x1ff   :  { %v2263_v21 = vadd.f32 %v4534_v36, %v2250_v20 }
 0x205   :  { %v2223_v43 = vpop.f32.mrf.mxu2 }
 0x206   :  { %v2264_v44 = vpop.f32.mrf.mxu1  ;;  %v2224_v37 = vadd.f32 %v2223_v43, %v2211_v8 }
 0x20d   :  { %v2301_v47 = vpop.f32.mrf.mxu0  ;;  %v2225_v11 = vpop.f32.mrf.mxu2 }
 0x20e   :  { %v2302_v32 = vadd.f32 %v2301_v47, %v1491_v31 }
 0x213   :  { %v2184_v54 = vpop.f32.mrf.mxu3 }
 0x214   :  { %v2185_v55 = vadd.f32 %v2184_v54, %v2172_v51 }
 0x215   :  { %v2303_v57 = vpop.f32.mrf.mxu0  ;;  %v2275_v62 = vpop.f32.mrf.mxu2 }
 0x216   :  { %v2344_v58 = vmax.f32 %v2185_v55, 0.0  ;;  %v2276_v22 = vadd.f32 %v2275_v62, %v2263_v21 }
 0x218   :  { %v2348_v63 = vpack.c.bf16 %v2344_v58, %v2344_v58 }
 0x21a   :  { %2617 = vmatmul.bf16.vlgmr.msrb.gmra.mxu0 %v2348_v63 }
 0x21b   :  { %v2186_v3 = vpop.f32.mrf.mxu3 }
 0x21d   :  { %v2277_v7 = vpop.f32.mrf.mxu2 }
 0x21e   :  { %v2314_v6 = vpop.f32.mrf.mxu1 }
 0x21f   :  { %v2315_v48 = vadd.f32 %v2314_v6, %v2302_v32 }
 0x223   :  { %v2236_v10 = vpop.f32.mrf.mxu3 }
 0x224   :  { %v2237_v12 = vadd.f32 %v2236_v10, %v2224_v37 }
 0x226   :  { %v2345_v14 = vmax.f32 %v2237_v12, 0.0  ;;  %v2316_v15 = vpop.f32.mrf.mxu1 }
 0x228   :  { %v2349_v61 = vpack.c.bf16 %v2345_v14, %v2345_v14 }
 0x22a   :  { %2630 = vmatmul.bf16.vlgmr.msrb.gmra.mxu1 %v2349_v61 }
 0x22b   :  { %v2238_v16 = vpop.f32.mrf.mxu3 }
 0x233   :  { %v2288_v23 = vpop.f32.mrf.mxu3 }
 0x234   :  { %v2289_v24 = vadd.f32 %v2288_v23, %v2276_v22 }
 0x235   :  { %v2327_v26 = vpop.f32.mrf.mxu2 }
 0x236   :  { %v2346_v27 = vmax.f32 %v2289_v24, 0.0  ;;  %v2328_v25 = vadd.f32 %v2327_v26, %v2315_v48 }
 0x238   :  { %v2350_v28 = vpack.c.bf16 %v2346_v27, %v2346_v27 }
 0x23a   :  { %2643 = vmatmul.bf16.vlgmr.msrb.gmra.mxu2 %v2350_v28 }
 0x23b   :  { %v2290_v29 = vpop.f32.mrf.mxu3 }
 0x23d   :  { %v2329_v30 = vpop.f32.mrf.mxu2 }
 0x253   :  { %v2340_v33 = vpop.f32.mrf.mxu3 }
 0x254   :  { %v2341_v53 = vadd.f32 %v2340_v33, %v2328_v25 }
 0x256   :  { %v2347_v34 = vmax.f32 %v2341_v53, 0.0 }
 0x258   :  { %v2351_v35 = vpack.c.bf16 %v2347_v34, %v2347_v34 }
 0x25a   :  { %2656 = vmatmul.bf16.vlgmr.msrb.gmra.mxu3 %v2351_v35 }
 0x25b   :  { %v2342_v36 = vpop.f32.mrf.mxu3 }
 0x297   :  { %v2618_v38 = vpop.f32.mrf.mxu0 }
 0x298   :  { %v2619_v46 = vadd.f32 %v2618_v38, %v2416_v45 }
 0x29f   :  { %v2620_v39 = vpop.f32.mrf.mxu0 }
 0x2a7   :  { %v2631_v40 = vpop.f32.mrf.mxu1 }
 0x2a8   :  { %v2632_v49 = vadd.f32 %v2631_v40, %v2619_v46 }
 0x2af   :  { %v2633_v41 = vpop.f32.mrf.mxu1 }
 0x2bd   :  { %v2644_v43 = vpop.f32.mrf.mxu2 }
 0x2be   :  { %v2645_v47 = vadd.f32 %v2644_v43, %v2632_v49 }
 0x2c5   :  { %v2646_v44 = vpop.f32.mrf.mxu2 }
 0x2dd   :  { %v2657_v11 = vpop.f32.mrf.mxu3 }
 0x2de   :  { %v2658_v50 = vadd.f32 %v2657_v11, %v2645_v47 }
 0x2e0   :  { %v2666_v51 = vmax.f32 %v2658_v50, -20.0 }
 0x2e2   :  { %v2667_v52 = vmin.f32 %v2666_v51, 2.0 }
 0x2e4   :  { %v2668_v54 = vsel %vm2665_vm2, %v2667_v52, %v2658_v50 }
 0x2e5   :  { %2669 = vst [vmem:[%s4555_s6] sm:$0xff] %v2668_v54  ;;  %v2659_v55 = vpop.f32.mrf.mxu3 }
 0x2e6   :  { %2674 = vsyncpa [#allocation3], 1 }
 0x2e7   :  { %2675 = vsyncpa [#allocation5], 1 }
 0x2e8   :  { %2676 = vsyncpa [#allocation8], 1 }

</bundles_post_ra>
